<compile_context>
chip_gen: v6e
topology: v6e:2x2x1
jax: 0.10.0
libtpu: 0.0.40
codegen_flags: <defaults>
</compile_context>

<pallas_src>
import functools

import jax
import jax.numpy as jnp
from jax import lax
from jax.experimental import pallas as pl
from jax.experimental.pallas import tpu as pltpu

_NEG = -1e30     # "minus infinity": folds the adjacency mask into the edge weights
_LANE = 128
_G = 8           # src columns handled per fori_loop iteration (the "modest unroll")


# ----------------------------- Pallas kernel -------------------------------- #

def _gine_layer_kernel(ew_t_ref, h_ref, w_ref, b_ref, out_ref, acc_ref, *,
                       tm, tk, eps, apply_act, apply_softmax, n_valid_classes):
    """One GINEConv layer, one (dst tile, src chunk) grid step.

    ew_t_ref : (TK, TM)    masked edge weights, TRANSPOSED (src, dst); -1e30 = no edge
    h_ref    : (N_pad, D)  previous-layer features, resident in VMEM for the whole call
    w_ref    : (D, Dout), b_ref : (1, Dout)   lane-padded, resident
    out_ref  : (TM, Dout)
    acc_ref  : (TM, D)     f32 message accumulator (VMEM scratch, lives across chunks)
    """
    i = pl.program_id(0)          # dst tile  ("parallel")
    c = pl.program_id(1)          # src chunk (reduction axis, "arbitrary", innermost)
    d_in = h_ref.shape[1]

    @pl.when(c == 0)
    def _init():
        acc_ref[...] = jnp.zeros_like(acc_ref)

    chunk_base = c * tk           # global src row index of this chunk

    def group_body(g, part):
        src_loc = pl.multiple_of(g * _G, _G)               # block-local src row
        src_glb = pl.multiple_of(chunk_base + g * _G, _G)  # global src row
        ew_slab = ew_t_ref[pl.ds(src_loc, _G), :]          # (G, TM)  src x dst
        h_slab = h_ref[pl.ds(src_glb, _G), :]              # (G, D)   src features
        for t in range(_G):       # static unroll; working set ~2x16 vregs
            # one-hot row t (compile-time constant)
            sel = (lax.broadcasted_iota(jnp.int32, (_G, d_in), 0) == t
                   ).astype(jnp.float32)
            # MXU lane-broadcast:  B[i, d] = sum_g ew_slab[g, i] * sel[g, d]
            #                             = ew[src = base + t, dst = i]
            bcast = lax.dot_general(ew_slab, sel, (((0,), (0,)), ((), ())),
                                    preferred_element_type=jnp.float32)  # (TM, D)
            pre = bcast + h_slab[t:t + 1, :]       # VPU add, (1, D) sublane-broadcast
            part = part + jnp.maximum(pre, 0.0)    # VPU relu + accumulate
        return part

    part0 = jnp.zeros((tm, d_in), jnp.float32)
    part = lax.fori_loop(0, tk // _G, group_body, part0)
    acc_ref[...] += part

    @pl.when(c == pl.num_programs(1) - 1)
    def _finalize():
        h_dst = h_ref[pl.ds(pl.multiple_of(i * tm, tm), tm), :]   # dst tile from resident h
        agg = acc_ref[...]
        z = agg + h_dst if eps == 0.0 else agg + (1.0 + eps) * h_dst
        out = jnp.dot(z, w_ref[...], preferred_element_type=jnp.float32) + b_ref[...]
        if apply_act:
            out = jnp.maximum(out, 0.0)
        if apply_softmax:
            # mask padded class lanes, then row softmax (fused epilogue)
            lane = lax.broadcasted_iota(jnp.int32, out.shape, 1)
            out = jnp.where(lane < n_valid_classes, out, _NEG)
            m = jnp.max(out, axis=-1, keepdims=True)
            e = jnp.exp(out - m)
            out = e / jnp.sum(e, axis=-1, keepdims=True)
        out_ref[...] = out.astype(out_ref.dtype)


# ------------------------------- wrappers ------------------------------------ #

def _round_up(x, m):
    return (x + m - 1) // m * m


def _pad2d(x, shape, value=0.0):
    return jnp.pad(x, [(0, s - d) for d, s in zip(x.shape, shape)],
                   constant_values=value)


def gine_conv_layer(h, ew_t_masked, w, b, *, tm, tk, eps=0.0, apply_act=True,
                    apply_softmax=False, n_valid_classes=0):
    """One GINEConv layer on padded, lane-dense inputs.

    h: (N_pad, Din); ew_t_masked: (N_pad, N_pad) transposed (src, dst);
    w: (Din, Dout); b: (1, Dout)."""
    n_pad, d_in = h.shape
    d_out = w.shape[1]
    assert n_pad % tm == 0 and n_pad % tk == 0 and tk % _G == 0
    assert d_in % _LANE == 0 and d_out % _LANE == 0

    kernel = functools.partial(
        _gine_layer_kernel, tm=tm, tk=tk, eps=float(eps), apply_act=bool(apply_act),
        apply_softmax=bool(apply_softmax), n_valid_classes=int(n_valid_classes))

    return pl.pallas_call(
        kernel,
        out_shape=jax.ShapeDtypeStruct((n_pad, d_out), jnp.float32),
        grid=(n_pad // tm, n_pad // tk),
        in_specs=[
            pl.BlockSpec((tk, tm), lambda i, c: (c, i)),         # ew_T, streamed
            pl.BlockSpec((n_pad, d_in), lambda i, c: (0, 0)),    # h, resident
            pl.BlockSpec((d_in, d_out), lambda i, c: (0, 0)),    # W, resident
            pl.BlockSpec((1, d_out), lambda i, c: (0, 0)),       # b, resident
        ],
        out_specs=pl.BlockSpec((tm, d_out), lambda i, c: (i, 0)),
        scratch_shapes=[pltpu.VMEM((tm, d_in), jnp.float32)],
        compiler_params=pltpu.CompilerParams(
            dimension_semantics=("parallel", "arbitrary")),
    )(ew_t_masked, h, w, b)


def init_gine_params(key, n_infeat, n_hidden, n_classes, n_layers):
    """Deterministic parameter init matching GINE.__init__ layer shapes."""
    dims = [(n_infeat, n_hidden)]
    dims += [(n_hidden, n_hidden) for _ in range(n_layers - 1)]
    dims += [(n_hidden, n_classes)]
    params = []
    for li, (din, dout) in enumerate(dims):
        kw = jax.random.fold_in(key, 2 * li)
        kb = jax.random.fold_in(key, 2 * li + 1)
        scale = 1.0 / jnp.sqrt(jnp.float32(din))
        w = jax.random.uniform(kw, (din, dout), jnp.float32, -scale, scale)
        b = jax.random.uniform(kb, (1, dout), jnp.float32, -scale, scale)
        params.append((w, b))
    return params


def gine_forward(params, features, adj_t, edge_weight_t):
    """Full GINE.forward: stacked GINEConv layers (ReLU on all but last) + row softmax.

    features: (N, Din); adj_t / edge_weight_t: dense (dst, src) (N, N) arrays.
    """
    n = features.shape[0]
    n_classes = params[-1][0].shape[1]

    # --- tiling / padding (lane-dense even for tiny graphs) ------------------ #
    n_pad = _round_up(max(n, _LANE), _LANE)
    tm = _LANE
    tk = 512 if n_pad % 512 == 0 else (256 if n_pad % 256 == 0 else _LANE)

    # Fold the adjacency mask into the edge weights (-1e30 for non-edges / padding)
    # and transpose to (src, dst): the kernel then only needs dynamic *sublane*
    # slices + an MXU one-hot matmul for the lane-broadcast.
    ew_masked = jnp.where(adj_t > 0, edge_weight_t.astype(jnp.float32), _NEG)
    ew_t = _pad2d(ew_masked.T, (n_pad, n_pad), value=_NEG)

    h = _pad2d(features.astype(jnp.float32),
               (n_pad, _round_up(features.shape[1], _LANE)))

    n_layers_total = len(params)
    for li, (w, b) in enumerate(params):
        d_i, d_o = w.shape
        # Zero rows/cols of the padded W are load-bearing (they cancel messages in
        # padded feature lanes) — jnp.pad with default 0.0 guarantees this.
        w_p = _pad2d(w.astype(jnp.float32),
                     (_round_up(d_i, _LANE), _round_up(d_o, _LANE)))
        b_p = _pad2d(b.astype(jnp.float32).reshape(1, -1), (1, _round_up(d_o, _LANE)))
        last = li == n_layers_total - 1
        h = gine_conv_layer(h, ew_t, w_p, b_p, tm=tm, tk=tk, eps=0.0,
                            apply_act=not last, apply_softmax=last,
                            n_valid_classes=n_classes)
    return h[:n, :n_classes]


def gine_forward_ref(params, features, adj_t, edge_weight_t):
    """Pure-JAX reference (same dense formulation) for correctness checking."""
    h = features
    n_layers_total = len(params)
    for li, (w, b) in enumerate(params):
        msgs = jnp.maximum(h[None, :, :] + edge_weight_t[:, :, None], 0.0)
        agg = jnp.sum(msgs * adj_t[:, :, None], axis=1)
        out = (h + agg) @ w + b
        if li < n_layers_total - 1:
            out = jnp.maximum(out, 0.0)
        h = out
    return jax.nn.softmax(h, axis=-1)


# --------------------------------- demo --------------------------------------- #

if __name__ == "__main__":
    key = jax.random.PRNGKey(0)

    N = 8            # number of graph nodes
    n_infeat = 4
    n_hidden = 32
    n_classes = 3
    n_layers = 2     # GINE builds n_layers + 1 GINEConv layers in total

    k_feat, k_adj, k_ew, k_par = jax.random.split(key, 4)

    # node features (N, n_infeat)
    features = jax.random.normal(k_feat, (N, n_infeat), jnp.float32)

    # random directed graph as a dense (dst, src) adjacency mask (no self loops)
    adj_t = (jax.random.uniform(k_adj, (N, N)) < 0.4).astype(jnp.float32)
    adj_t = adj_t * (1.0 - jnp.eye(N, dtype=jnp.float32))

    # scalar edge weights, dense (dst, src), zero where there is no edge
    edge_weight_t = jax.random.uniform(k_ew, (N, N), jnp.float32, 0.1, 1.0) * adj_t

    params = init_gine_params(k_par, n_infeat, n_hidden, n_classes, n_layers)

    out = gine_forward(params, features, adj_t, edge_weight_t)
    out = jax.block_until_ready(out)

    assert out.shape == (N, n_classes)
    # rows of a softmax must sum to 1
    assert bool(jnp.allclose(jnp.sum(out, axis=-1), 1.0, atol=1e-5))
    # match the pure-JAX reference
    ref = gine_forward_ref(params, features, adj_t, edge_weight_t)
    assert bool(jnp.allclose(out, ref, rtol=1e-2, atol=1e-3)), "mismatch vs JAX reference"

    print("KERNEL_OK")
</pallas_src>

<mosaic_0001>
module attributes {stable_mosaic.version = 11 : i64} {
  func.func @_gine_layer_kernel(%arg0: i32, %arg1: i32, %arg2: memref<128x128xf32, #tpu.memory_space<vmem>>, %arg3: memref<128x128xf32, #tpu.memory_space<vmem>>, %arg4: memref<128x128xf32, #tpu.memory_space<vmem>>, %arg5: memref<1x128xf32, #tpu.memory_space<vmem>>, %arg6: memref<128x128xf32, #tpu.memory_space<vmem>>, %arg7: memref<128x128xf32, #tpu.memory_space<vmem>>) attributes {dimension_semantics = [#tpu.dimension_semantics<parallel>, #tpu.dimension_semantics<arbitrary>], iteration_bounds = array<i64: 1, 1>, scalar_prefetch = 0 : i64, scratch_operands = 1 : i64, tpu.core_type = #tpu.core_type<tc>, window_params = [{transform_indices = @transform_0, window_bounds = array<i64: 128, 128>}, {pipeline_mode = #tpu.pipeline_mode<synchronous>, transform_indices = @transform_1, window_bounds = array<i64: 128, 128>}, {pipeline_mode = #tpu.pipeline_mode<synchronous>, transform_indices = @transform_2, window_bounds = array<i64: 128, 128>}, {pipeline_mode = #tpu.pipeline_mode<synchronous>, transform_indices = @transform_3, window_bounds = array<i64: 1, 128>}, {transform_indices = @transform_4, window_bounds = array<i64: 128, 128>}]} {
    %c0_i32 = arith.constant 0 : i32
    %0 = arith.cmpi eq, %arg1, %c0_i32 : i32
    %1 = arith.extui %0 : i1 to i32
    %c0_i32_0 = arith.constant 0 : i32
    %2 = arith.cmpi ne, %1, %c0_i32_0 : i32
    scf.if %2 {
      %cst_8 = arith.constant 0.000000e+00 : f32
      %13 = vector.broadcast %cst_8 : f32 to vector<128x128xf32>
      %c0_9 = arith.constant 0 : index
      %c0_10 = arith.constant 0 : index
      %14 = vector.load %arg7[%c0_9, %c0_10] : memref<128x128xf32, #tpu.memory_space<vmem>>, vector<128x128xf32>
      tpu.vector_store %arg7[%c0_9, %c0_10], %13 {strides = array<i32>} : memref<128x128xf32, #tpu.memory_space<vmem>>, vector<128x128xf32>,
    } else {
    }
    %c128_i32 = arith.constant 128 : i32
    %3 = arith.muli %arg1, %c128_i32 : i32
    %cst = arith.constant 0.000000e+00 : f32
    %4 = vector.broadcast %cst : f32 to vector<128x128xf32>
    %c0_i32_1 = arith.constant 0 : i32
    %c16_i32 = arith.constant 16 : i32
    %5 = arith.addi %c0_i32_1, %c16_i32 : i32
    %c1_i32 = arith.constant 1 : i32
    %6 = scf.for %arg8 = %c0_i32_1 to %5 step %c1_i32 iter_args(%arg9 = %4) -> (vector<128x128xf32>)  : i32 {
      %c8_i32 = arith.constant 8 : i32
      %13 = arith.muli %arg8, %c8_i32 : i32
      %14 = tpu.assume_multiple %13, 8 : i32
      %c8_i32_8 = arith.constant 8 : i32
      %15 = arith.muli %arg8, %c8_i32_8 : i32
      %16 = arith.addi %3, %15 : i32
      %17 = tpu.assume_multiple %16, 8 : i32
      %18 = arith.index_cast %14 : i32 to index
      %c0_9 = arith.constant 0 : index
      %19 = vector.load %arg2[%18, %c0_9] : memref<128x128xf32, #tpu.memory_space<vmem>>, vector<8x128xf32>
      %20 = arith.index_cast %17 : i32 to index
      %c0_10 = arith.constant 0 : index
      %21 = vector.load %arg3[%20, %c0_10] : memref<128x128xf32, #tpu.memory_space<vmem>>, vector<8x128xf32>
      %22 = tpu.iota {dimensions = array<i32: 0>} : vector<8x128xi32>
      %c0_i32_11 = arith.constant 0 : i32
      %23 = vector.broadcast %c0_i32_11 : i32 to vector<8x128xi32>
      %24 = arith.cmpi eq, %22, %23 : vector<8x128xi32>
      %25 = arith.extui %24 : vector<8x128xi1> to vector<8x128xi32>
      %26 = arith.sitofp %25 : vector<8x128xi32> to vector<8x128xf32>
      %cst_12 = arith.constant dense<0.000000e+00> : vector<128x128xf32>
      %27 = tpu.matmul %19, %26, %cst_12 {dimension_numbers = #tpu.dot_dimension_numbers<[0], [0], [1], [1], [0, 1, 1, 1], [], []>} : vector<8x128xf32>, vector<8x128xf32>, vector<128x128xf32> -> vector<128x128xf32>
      %28 = vector.extract_strided_slice %21 {offsets = [0, 0], sizes = [1, 128], strides = [1, 1]} : vector<8x128xf32> to vector<1x128xf32>
      %29 = vector.broadcast %28 : vector<1x128xf32> to vector<128x128xf32>
      %30 = arith.addf %27, %29 : vector<128x128xf32>
      %cst_13 = arith.constant 0.000000e+00 : f32
      %31 = vector.broadcast %cst_13 : f32 to vector<128x128xf32>
      %32 = arith.maximumf %30, %31 : vector<128x128xf32>
      %33 = arith.addf %arg9, %32 : vector<128x128xf32>
      %34 = tpu.iota {dimensions = array<i32: 0>} : vector<8x128xi32>
      %c1_i32_14 = arith.constant 1 : i32
      %35 = vector.broadcast %c1_i32_14 : i32 to vector<8x128xi32>
      %36 = arith.cmpi eq, %34, %35 : vector<8x128xi32>
      %37 = arith.extui %36 : vector<8x128xi1> to vector<8x128xi32>
      %38 = arith.sitofp %37 : vector<8x128xi32> to vector<8x128xf32>
      %cst_15 = arith.constant dense<0.000000e+00> : vector<128x128xf32>
      %39 = tpu.matmul %19, %38, %cst_15 {dimension_numbers = #tpu.dot_dimension_numbers<[0], [0], [1], [1], [0, 1, 1, 1], [], []>} : vector<8x128xf32>, vector<8x128xf32>, vector<128x128xf32> -> vector<128x128xf32>
      %40 = vector.extract_strided_slice %21 {offsets = [1, 0], sizes = [1, 128], strides = [1, 1]} : vector<8x128xf32> to vector<1x128xf32>
      %41 = vector.broadcast %40 : vector<1x128xf32> to vector<128x128xf32>
      %42 = arith.addf %39, %41 : vector<128x128xf32>
      %cst_16 = arith.constant 0.000000e+00 : f32
      %43 = vector.broadcast %cst_16 : f32 to vector<128x128xf32>
      %44 = arith.maximumf %42, %43 : vector<128x128xf32>
      %45 = arith.addf %33, %44 : vector<128x128xf32>
      %46 = tpu.iota {dimensions = array<i32: 0>} : vector<8x128xi32>
      %c2_i32 = arith.constant 2 : i32
      %47 = vector.broadcast %c2_i32 : i32 to vector<8x128xi32>
      %48 = arith.cmpi eq, %46, %47 : vector<8x128xi32>
      %49 = arith.extui %48 : vector<8x128xi1> to vector<8x128xi32>
      %50 = arith.sitofp %49 : vector<8x128xi32> to vector<8x128xf32>
      %cst_17 = arith.constant dense<0.000000e+00> : vector<128x128xf32>
      %51 = tpu.matmul %19, %50, %cst_17 {dimension_numbers = #tpu.dot_dimension_numbers<[0], [0], [1], [1], [0, 1, 1, 1], [], []>} : vector<8x128xf32>, vector<8x128xf32>, vector<128x128xf32> -> vector<128x128xf32>
      %52 = vector.extract_strided_slice %21 {offsets = [2, 0], sizes = [1, 128], strides = [1, 1]} : vector<8x128xf32> to vector<1x128xf32>
      %53 = vector.broadcast %52 : vector<1x128xf32> to vector<128x128xf32>
      %54 = arith.addf %51, %53 : vector<128x128xf32>
      %cst_18 = arith.constant 0.000000e+00 : f32
      %55 = vector.broadcast %cst_18 : f32 to vector<128x128xf32>
      %56 = arith.maximumf %54, %55 : vector<128x128xf32>
      %57 = arith.addf %45, %56 : vector<128x128xf32>
      %58 = tpu.iota {dimensions = array<i32: 0>} : vector<8x128xi32>
      %c3_i32 = arith.constant 3 : i32
      %59 = vector.broadcast %c3_i32 : i32 to vector<8x128xi32>
      %60 = arith.cmpi eq, %58, %59 : vector<8x128xi32>
      %61 = arith.extui %60 : vector<8x128xi1> to vector<8x128xi32>
      %62 = arith.sitofp %61 : vector<8x128xi32> to vector<8x128xf32>
      %cst_19 = arith.constant dense<0.000000e+00> : vector<128x128xf32>
      %63 = tpu.matmul %19, %62, %cst_19 {dimension_numbers = #tpu.dot_dimension_numbers<[0], [0], [1], [1], [0, 1, 1, 1], [], []>} : vector<8x128xf32>, vector<8x128xf32>, vector<128x128xf32> -> vector<128x128xf32>
      %64 = vector.extract_strided_slice %21 {offsets = [3, 0], sizes = [1, 128], strides = [1, 1]} : vector<8x128xf32> to vector<1x128xf32>
      %65 = vector.broadcast %64 : vector<1x128xf32> to vector<128x128xf32>
      %66 = arith.addf %63, %65 : vector<128x128xf32>
      %cst_20 = arith.constant 0.000000e+00 : f32
      %67 = vector.broadcast %cst_20 : f32 to vector<128x128xf32>
      %68 = arith.maximumf %66, %67 : vector<128x128xf32>
      %69 = arith.addf %57, %68 : vector<128x128xf32>
      %70 = tpu.iota {dimensions = array<i32: 0>} : vector<8x128xi32>
      %c4_i32 = arith.constant 4 : i32
      %71 = vector.broadcast %c4_i32 : i32 to vector<8x128xi32>
      %72 = arith.cmpi eq, %70, %71 : vector<8x128xi32>
      %73 = arith.extui %72 : vector<8x128xi1> to vector<8x128xi32>
      %74 = arith.sitofp %73 : vector<8x128xi32> to vector<8x128xf32>
      %cst_21 = arith.constant dense<0.000000e+00> : vector<128x128xf32>
      %75 = tpu.matmul %19, %74, %cst_21 {dimension_numbers = #tpu.dot_dimension_numbers<[0], [0], [1], [1], [0, 1, 1, 1], [], []>} : vector<8x128xf32>, vector<8x128xf32>, vector<128x128xf32> -> vector<128x128xf32>
      %76 = vector.extract_strided_slice %21 {offsets = [4, 0], sizes = [1, 128], strides = [1, 1]} : vector<8x128xf32> to vector<1x128xf32>
      %77 = vector.broadcast %76 : vector<1x128xf32> to vector<128x128xf32>
      %78 = arith.addf %75, %77 : vector<128x128xf32>
      %cst_22 = arith.constant 0.000000e+00 : f32
      %79 = vector.broadcast %cst_22 : f32 to vector<128x128xf32>
      %80 = arith.maximumf %78, %79 : vector<128x128xf32>
      %81 = arith.addf %69, %80 : vector<128x128xf32>
      %82 = tpu.iota {dimensions = array<i32: 0>} : vector<8x128xi32>
      %c5_i32 = arith.constant 5 : i32
      %83 = vector.broadcast %c5_i32 : i32 to vector<8x128xi32>
      %84 = arith.cmpi eq, %82, %83 : vector<8x128xi32>
      %85 = arith.extui %84 : vector<8x128xi1> to vector<8x128xi32>
      %86 = arith.sitofp %85 : vector<8x128xi32> to vector<8x128xf32>
      %cst_23 = arith.constant dense<0.000000e+00> : vector<128x128xf32>
      %87 = tpu.matmul %19, %86, %cst_23 {dimension_numbers = #tpu.dot_dimension_numbers<[0], [0], [1], [1], [0, 1, 1, 1], [], []>} : vector<8x128xf32>, vector<8x128xf32>, vector<128x128xf32> -> vector<128x128xf32>
      %88 = vector.extract_strided_slice %21 {offsets = [5, 0], sizes = [1, 128], strides = [1, 1]} : vector<8x128xf32> to vector<1x128xf32>
      %89 = vector.broadcast %88 : vector<1x128xf32> to vector<128x128xf32>
      %90 = arith.addf %87, %89 : vector<128x128xf32>
      %cst_24 = arith.constant 0.000000e+00 : f32
      %91 = vector.broadcast %cst_24 : f32 to vector<128x128xf32>
      %92 = arith.maximumf %90, %91 : vector<128x128xf32>
      %93 = arith.addf %81, %92 : vector<128x128xf32>
      %94 = tpu.iota {dimensions = array<i32: 0>} : vector<8x128xi32>
      %c6_i32 = arith.constant 6 : i32
      %95 = vector.broadcast %c6_i32 : i32 to vector<8x128xi32>
      %96 = arith.cmpi eq, %94, %95 : vector<8x128xi32>
      %97 = arith.extui %96 : vector<8x128xi1> to vector<8x128xi32>
      %98 = arith.sitofp %97 : vector<8x128xi32> to vector<8x128xf32>
      %cst_25 = arith.constant dense<0.000000e+00> : vector<128x128xf32>
      %99 = tpu.matmul %19, %98, %cst_25 {dimension_numbers = #tpu.dot_dimension_numbers<[0], [0], [1], [1], [0, 1, 1, 1], [], []>} : vector<8x128xf32>, vector<8x128xf32>, vector<128x128xf32> -> vector<128x128xf32>
      %100 = vector.extract_strided_slice %21 {offsets = [6, 0], sizes = [1, 128], strides = [1, 1]} : vector<8x128xf32> to vector<1x128xf32>
      %101 = vector.broadcast %100 : vector<1x128xf32> to vector<128x128xf32>
      %102 = arith.addf %99, %101 : vector<128x128xf32>
      %cst_26 = arith.constant 0.000000e+00 : f32
      %103 = vector.broadcast %cst_26 : f32 to vector<128x128xf32>
      %104 = arith.maximumf %102, %103 : vector<128x128xf32>
      %105 = arith.addf %93, %104 : vector<128x128xf32>
      %106 = tpu.iota {dimensions = array<i32: 0>} : vector<8x128xi32>
      %c7_i32 = arith.constant 7 : i32
      %107 = vector.broadcast %c7_i32 : i32 to vector<8x128xi32>
      %108 = arith.cmpi eq, %106, %107 : vector<8x128xi32>
      %109 = arith.extui %108 : vector<8x128xi1> to vector<8x128xi32>
      %110 = arith.sitofp %109 : vector<8x128xi32> to vector<8x128xf32>
      %cst_27 = arith.constant dense<0.000000e+00> : vector<128x128xf32>
      %111 = tpu.matmul %19, %110, %cst_27 {dimension_numbers = #tpu.dot_dimension_numbers<[0], [0], [1], [1], [0, 1, 1, 1], [], []>} : vector<8x128xf32>, vector<8x128xf32>, vector<128x128xf32> -> vector<128x128xf32>
      %112 = vector.extract_strided_slice %21 {offsets = [7, 0], sizes = [1, 128], strides = [1, 1]} : vector<8x128xf32> to vector<1x128xf32>
      %113 = vector.broadcast %112 : vector<1x128xf32> to vector<128x128xf32>
      %114 = arith.addf %111, %113 : vector<128x128xf32>
      %cst_28 = arith.constant 0.000000e+00 : f32
      %115 = vector.broadcast %cst_28 : f32 to vector<128x128xf32>
      %116 = arith.maximumf %114, %115 : vector<128x128xf32>
      %117 = arith.addf %105, %116 : vector<128x128xf32>
      scf.yield %117 : vector<128x128xf32>
    }
    %c16_i32_2 = arith.constant 16 : i32
    %c0 = arith.constant 0 : index
    %c0_3 = arith.constant 0 : index
    %7 = vector.load %arg7[%c0, %c0_3] : memref<128x128xf32, #tpu.memory_space<vmem>>, vector<128x128xf32>
    %8 = arith.addf %7, %6 : vector<128x128xf32>
    %c0_4 = arith.constant 0 : index
    %c0_5 = arith.constant 0 : index
    %9 = vector.load %arg7[%c0_4, %c0_5] : memref<128x128xf32, #tpu.memory_space<vmem>>, vector<128x128xf32>
    tpu.vector_store %arg7[%c0_4, %c0_5], %8 {strides = array<i32>} : memref<128x128xf32, #tpu.memory_space<vmem>>, vector<128x128xf32>,
    %c0_i32_6 = arith.constant 0 : i32
    %10 = arith.cmpi eq, %arg1, %c0_i32_6 : i32
    %11 = arith.extui %10 : i1 to i32
    %c0_i32_7 = arith.constant 0 : i32
    %12 = arith.cmpi ne, %11, %c0_i32_7 : i32
    scf.if %12 {
      %c128_i32_8 = arith.constant 128 : i32
      %13 = arith.muli %arg0, %c128_i32_8 : i32
      %14 = tpu.assume_multiple %13, 128 : i32
      %15 = arith.index_cast %14 : i32 to index
      %c0_9 = arith.constant 0 : index
      %16 = vector.load %arg3[%15, %c0_9] : memref<128x128xf32, #tpu.memory_space<vmem>>, vector<128x128xf32>
      %c0_10 = arith.constant 0 : index
      %c0_11 = arith.constant 0 : index
      %17 = vector.load %arg7[%c0_10, %c0_11] : memref<128x128xf32, #tpu.memory_space<vmem>>, vector<128x128xf32>
      %18 = arith.addf %17, %16 : vector<128x128xf32>
      %c0_12 = arith.constant 0 : index
      %c0_13 = arith.constant 0 : index
      %19 = vector.load %arg4[%c0_12, %c0_13] : memref<128x128xf32, #tpu.memory_space<vmem>>, vector<128x128xf32>
      %cst_14 = arith.constant dense<0.000000e+00> : vector<128x128xf32>
      %20 = tpu.matmul %18, %19, %cst_14 {dimension_numbers = #tpu.dot_dimension_numbers<[1], [0], [0], [1], [0, 0, 1, 1], [], []>} : vector<128x128xf32>, vector<128x128xf32>, vector<128x128xf32> -> vector<128x128xf32>
      %c0_15 = arith.constant 0 : index
      %c0_16 = arith.constant 0 : index
      %21 = vector.load %arg5[%c0_15, %c0_16] : memref<1x128xf32, #tpu.memory_space<vmem>>, vector<1x128xf32>
      %22 = vector.broadcast %21 : vector<1x128xf32> to vector<128x128xf32>
      %23 = arith.addf %20, %22 : vector<128x128xf32>
      %cst_17 = arith.constant 0.000000e+00 : f32
      %24 = vector.broadcast %cst_17 : f32 to vector<128x128xf32>
      %25 = arith.maximumf %23, %24 : vector<128x128xf32>
      %c0_18 = arith.constant 0 : index
      %c0_19 = arith.constant 0 : index
      %26 = vector.load %arg6[%c0_18, %c0_19] : memref<128x128xf32, #tpu.memory_space<vmem>>, vector<128x128xf32>
      tpu.vector_store %arg6[%c0_18, %c0_19], %25 {strides = array<i32>} : memref<128x128xf32, #tpu.memory_space<vmem>>, vector<128x128xf32>,
    } else {
    }
    return
  }
  func.func @transform_0(%arg0: i32, %arg1: i32) -> (i32, i32) {
    %c0_i32 = arith.constant 0 : i32
    return %arg1, %arg0 : i32, i32
  }
  func.func @transform_1(%arg0: i32, %arg1: i32) -> (i32, i32) {
    %c0_i32 = arith.constant 0 : i32
    %c0_i32_0 = arith.constant 0 : i32
    %c0_i32_1 = arith.constant 0 : i32
    return %c0_i32, %c0_i32_0 : i32, i32
  }
  func.func @transform_2(%arg0: i32, %arg1: i32) -> (i32, i32) {
    %c0_i32 = arith.constant 0 : i32
    %c0_i32_0 = arith.constant 0 : i32
    %c0_i32_1 = arith.constant 0 : i32
    return %c0_i32, %c0_i32_0 : i32, i32
  }
  func.func @transform_3(%arg0: i32, %arg1: i32) -> (i32, i32) {
    %c0_i32 = arith.constant 0 : i32
    %c0_i32_0 = arith.constant 0 : i32
    %c0_i32_1 = arith.constant 0 : i32
    return %c0_i32, %c0_i32_0 : i32, i32
  }
  func.func @transform_4(%arg0: i32, %arg1: i32) -> (i32, i32) {
    %c0_i32 = arith.constant 0 : i32
    %c0_i32_0 = arith.constant 0 : i32
    return %arg0, %c0_i32 : i32, i32
  }
}

</mosaic_0001>

<bundles_post_ra>
// kernel: tpu_custom_call.1
= control target key start
LH: loop header
LB: loop body
LE: loop exit
PB: predicated region body
PF: predicated region fallthrough
CT: control target
= control target key end

     0   :  { %9 = vsyncpa [#allocation4], 0  ;;  %s3987_s0 = inlined_call_operand.hbm [shape: f32[128,128], index: 0, kind: input, shape index: {}]   ;;  %s3988_s1 = inlined_call_operand.hbm [shape: f32[128,128], index: 1, kind: input, shape index: {}]   ;;  %s3989_s2 = inlined_call_operand.hbm [shape: f32[128,128], index: 2, kind: input, shape index: {}]   ;;  %s3990_s3 = inlined_call_operand.vmem [shape: f32[1,128], index: 3, kind: input, shape index: {}]   ;;  %s3991_s4 = inlined_call_operand.hbm [shape: f32[128,128], index: 4, kind: output, shape index: {}]  }
   0x1   :  { %10 = vsyncpa [#allocation7], 0 }
   0x2   :  { %11 = vsyncpa [#allocation5], 0  ;;  %s3016_s15 = smov [#allocation6]   ;;  %s3017_s17 = smov [#allocation3]  }
   0x3   :  { %s29_s16 = sshll.u32 %s3016_s15, 4  ;;  %s17_s18 = sshll.u32 %s3017_s17, 4  ;;  %s30_s16 = int_to_ptr.vmem [resolvable:$true] %s29_s16  ;;  %s18_s18 = int_to_ptr.vmem [resolvable:$true] %s17_s18 }
   0x4   :  { %s2802_s19 = scalar_lea.vmem %s30_s16, 2048  ;;  %p2807_p1 = scmp.lt.s32.totalorder %s30_s16, %s30_s16 }
   0x5   :  { %p2803_p0 = scmp.ne.s32.totalorder %s30_s16, %s2802_s19  ;;  %p2808_p2 = scmp.lt.s32.totalorder %s2802_s19, %s2802_s19 }
   0x7   :  { %p2809_p3 = por %p2808_p2, %p2807_p1 }
   0x9   :  { %p2810_p4 = pnand %p2809_p3, %p2803_p0 }
   0xb   :  { %2813 = shalt.err (!%p2810_p4)
}
   0xc   :  { %s3018_s20 = smov 128   ;;  %s3019_s21 = smov 8  }
   0xd   :  { %35 = dma.hbm_to_vmem [thread:$0]  %s3988_s1, 2048, %s30_s16, [#allocation7], %s3018_s20, %s3018_s20, %s3019_s21  }
   0xe   :  { %s2822_s24 = scalar_lea.vmem %s18_s18, 2048  ;;  %p2827_p6 = scmp.lt.s32.totalorder %s18_s18, %s18_s18 }
   0xf   :  { %p2823_p5 = scmp.ne.s32.totalorder %s18_s18, %s2822_s24  ;;  %p2828_p7 = scmp.lt.s32.totalorder %s2822_s24, %s2822_s24 }
  0x11   :  { %p2829_p8 = por %p2828_p7, %p2827_p6 }
  0x13   :  { %p2830_p9 = pnand %p2829_p8, %p2823_p5 }
  0x15   :  { %2833 = shalt.err (!%p2830_p9)
}
  0x16   :  { %23 = dma.hbm_to_vmem [thread:$0]  %s3987_s0, 2048, %s18_s18, [#allocation4], %s3018_s20, %s3018_s20, %s3019_s21  }
  0x17   :  { %s3020_s27 = smov [#allocation8]  }
  0x18   :  { %s41_s28 = sshll.u32 %s3020_s27, 4  ;;  %s42_s28 = int_to_ptr.vmem [resolvable:$true] %s41_s28 }
  0x19   :  { %s2842_s29 = scalar_lea.vmem %s42_s28, 2048  ;;  %p2847_p11 = scmp.lt.s32.totalorder %s42_s28, %s42_s28 }
  0x1a   :  { %p2843_p10 = scmp.ne.s32.totalorder %s42_s28, %s2842_s29  ;;  %p2848_p12 = scmp.lt.s32.totalorder %s2842_s29, %s2842_s29 }
  0x1c   :  { %p2849_p13 = por %p2848_p12, %p2847_p11 }
  0x1e   :  { %p2850_p0 = pnand %p2849_p13, %p2843_p10 }
  0x20   :  { %2853 = shalt.err (!%p2850_p0)
}
  0x21   :  { %47 = dma.hbm_to_vmem [thread:$0]  %s3989_s2, 2048, %s42_s28, [#allocation7], %s3018_s20, %s3018_s20, %s3019_s21  }
  0x22   :  { %2942 = dma.done.wait [#allocation4], 2048  }
  0x23   :  { %2943 = vsyncadd [#allocation4], 4294965248 }
  0x24   :  { %2944 = dma.done.wait [#allocation7], 4096  }
  0x25   :  { %2945 = vsyncadd [#allocation7], 4294963200  ;;  %v3021_v0 = vmov 0.0   ;;  %v3067_v1 = vmov 0.0   ;;  %v3069_v2 = vmov 0.0   ;;  %v3071_v3 = vmov 0.0  }
  0x26   :  { %63 = vst [vmem:[#allocation2 + $0x30] sm:$0xff] %v3021_v0  ;;  %64 = vst [vmem:[#allocation2] sm:$0xff] %v3021_v0  ;;  %v3073_v4 = vmov 0.0   ;;  %v3075_v5 = vmov 0.0   ;;  %v3077_v6 = vmov 0.0   ;;  %v3079_v7 = vmov 0.0  }
  0x27   :  { %65 = vst [vmem:[#allocation2 + $0x58] sm:$0xff] %v3021_v0  ;;  %66 = vst [vmem:[#allocation2 + $0x18] sm:$0xff] %v3021_v0  ;;  %v3081_v8 = vmov 0.0   ;;  %v3083_v9 = vmov 0.0   ;;  %v3085_v10 = vmov 0.0   ;;  %v3087_v11 = vmov 0.0  }
  0x28   :  { %67 = vst [vmem:[#allocation2 + $0x50] sm:$0xff] %v3021_v0  ;;  %68 = vst [vmem:[#allocation2 + $0x68] sm:$0xff] %v3021_v0  ;;  %v3089_v12 = vmov 0.0   ;;  %v3091_v13 = vmov 0.0   ;;  %v3093_v14 = vmov 0.0   ;;  %v3095_v15 = vmov 0.0  }
  0x29   :  { %69 = vst [vmem:[#allocation2 + $0x8] sm:$0xff] %v3021_v0  ;;  %70 = vst [vmem:[#allocation2 + $0x48] sm:$0xff] %v3021_v0  ;;  %v3097_v16 = vmov 0.0   ;;  %s3099_s0 = smov 0  }
  0x2a   :  { %71 = vst [vmem:[#allocation2 + $0x40] sm:$0xff] %v3021_v0  ;;  %72 = vst [vmem:[#allocation2 + $0x20] sm:$0xff] %v3021_v0 }
  0x2b   :  { %73 = vst [vmem:[#allocation2 + $0x10] sm:$0xff] %v3021_v0  ;;  %74 = vst [vmem:[#allocation2 + $0x38] sm:$0xff] %v3021_v0 }
  0x2c   :  { %75 = vst [vmem:[#allocation2 + $0x60] sm:$0xff] %v3021_v0  ;;  %76 = vst [vmem:[#allocation2 + $0x70] sm:$0xff] %v3021_v0 }
  0x2d   :  { %77 = vst [vmem:[#allocation2 + $0x78] sm:$0xff] %v3021_v0  ;;  %78 = vst [vmem:[#allocation2 + $0x28] sm:$0xff] %v3021_v0 }
  0x2e LB: > { %v108_v17 = vlaneseq  ;;  %s2039_s2 = sshll.u32 %s3014_s0, 3  ;;  %v3022_v20 = vmov 1.0   ;;  %vm149_vm4 = vcmask 64512   ;;  %s85_s0 = sadd.s32 1, %s3014_s0   ;;  %s3014_s0 = sphi %s3099_s0, %s85_s0   ;;  %v3010_v16 = vphi %v3097_v16, %v4022_v16   ;;  %v3006_v15 = vphi %v3095_v15, %v4021_v15   ;;  %v3002_v14 = vphi %v3093_v14, %v4020_v14   ;;  %v2998_v13 = vphi %v3091_v13, %v4019_v13   ;;  %v2994_v12 = vphi %v3089_v12, %v4018_v12   ;;  %v2990_v11 = vphi %v3087_v11, %v4017_v11   ;;  %v2986_v10 = vphi %v3085_v10, %v4016_v10   ;;  %v2982_v9 = vphi %v3083_v9, %v4015_v9   ;;  %v2978_v8 = vphi %v3081_v8, %v4014_v8   ;;  %v2974_v7 = vphi %v3079_v7, %v4013_v7   ;;  %v2970_v6 = vphi %v3077_v6, %v4012_v6   ;;  %v2966_v5 = vphi %v3075_v5, %v4011_v5   ;;  %v2962_v4 = vphi %v3073_v4, %v4010_v4   ;;  %v2958_v3 = vphi %v3071_v3, %v4009_v3   ;;  %v2954_v2 = vphi %v3069_v2, %v4008_v2   ;;  %v2950_v1 = vphi %v3067_v1, %v4007_v1  }
  0x2f   : > { %s104_s5 = scalar_lea.vmem [#allocation3], %s2039_s2  ;;  %s106_s6 = scalar_lea.vmem [#allocation6], %s2039_s2 }
  0x30   : > { %v3153_v18 = vshrl.u32 %v108_v17, 7  ;;  %v105_v19 = vld [vmem:[%s104_s5] sm:$0xff]  ;;  %p3842_p1 = scmp.ge.s32.totalorder %s85_s0, 16  }
  0x31   : > { %117 = vxpose.xlu0.b32.start.end [1/1] (short) %v105_v19, 128  ;;  %v3489_v39 = vld [vmem:[%s106_s6] sm:$0xff] }
  0x32   : > { %vm110_vm0 = vcmp.eq.s32.totalorder %v3153_v18, 0  ;;  %vm375_vm1 = vcmp.eq.s32.totalorder %v3153_v18, 1  ;;  %vm559_vm2 = vcmp.eq.s32.totalorder %v3153_v18, 2  ;;  %vm743_vm3 = vcmp.eq.s32.totalorder %v3153_v18, 3 }
  0x33   : > { %2353 = vmatprep.subr.msk.mxu0 %vm110_vm0, %v3022_v20  ;;  %2379 = vmatprep.subr.msk.mxu1 %vm375_vm1, %v3022_v20  ;;  %vm927_vm5 = vcmp.eq.s32.totalorder %v3153_v18, 4  ;;  %vm1111_vm6 = vcmp.eq.s32.totalorder %v3153_v18, 5  ;;  %vm1295_vm7 = vcmp.eq.s32.totalorder %v3153_v18, 6  ;;  %vm1479_vm8 = vcmp.eq.s32.totalorder %v3153_v18, 7 }
  0x34   : > { %2354 = vmatpush3.msk.msra.mxu0 %vm110_vm0, %v3022_v20  ;;  %2380 = vmatpush3.msk.msra.mxu1 %vm375_vm1, %v3022_v20  ;;  %v115_v37 = vsub.s32 0, %v3153_v18  ;;  %v380_v38 = vsub.s32 1, %v3153_v18 }
  0x35   : > { %2405 = vmatprep.subr.msk.mxu0 %vm559_vm2, %v3022_v20  ;;  %2431 = vmatprep.subr.msk.mxu1 %vm743_vm3, %v3022_v20 }
  0x36   : > { %v3492_v40 = vrot.slane %v3489_v39, %v115_v37  ;;  %v3495_v41 = vrot.slane %v3489_v39, %v380_v38 }
  0xad   : > { %v3167_v21 = vpop.trf.xlu0 }
  0xae   : > { %2355 = vmatprep.mubr.msk.f32.mxu0 %vm149_vm4, %v3167_v21  ;;  %2381 = vmatprep.mubr.msk.f32.mxu1 %vm149_vm4, %v3167_v21 }
  0xb1   : > { %v3173_v22 = vpop.trf.xlu0 }
  0xb2   : > { %2356 = vmatmul.mubr.msk.f32.vlgmr.msra.gmra.mxu0 %vm149_vm4, %v3173_v22  ;;  %2382 = vmatmul.mubr.msk.f32.vlgmr.msra.gmra.mxu1 %vm149_vm4, %v3173_v22 }
  0xb3   : > { %2406 = vmatpush3.msk.msra.mxu0 %vm559_vm2, %v3022_v20  ;;  %2432 = vmatpush3.msk.msra.mxu1 %vm743_vm3, %v3022_v20 }
  0xb4   : > { %2457 = vmatprep.subr.msk.mxu0 %vm927_vm5, %v3022_v20  ;;  %2483 = vmatprep.subr.msk.mxu1 %vm1111_vm6, %v3022_v20 }
  0xb5   : > { %v3189_v23 = vpop.trf.xlu0 }
  0xb6   : > { %2358 = vmatprep.mubr.msk.f32.mxu0 %vm149_vm4, %v3189_v23  ;;  %2384 = vmatprep.mubr.msk.f32.mxu1 %vm149_vm4, %v3189_v23 }
  0xb9   : > { %v3195_v24 = vpop.trf.xlu0 }
  0xba   : > { %2359 = vmatmul.mubr.msk.f32.gmra.mxu0 %vm149_vm4, %v3195_v24  ;;  %2385 = vmatmul.mubr.msk.f32.gmra.mxu1 %vm149_vm4, %v3195_v24 }
  0xbd   : > { %v3201_v25 = vpop.trf.xlu0 }
  0xbe   : > { %2361 = vmatprep.mubr.msk.f32.mxu0 %vm149_vm4, %v3201_v25  ;;  %2387 = vmatprep.mubr.msk.f32.mxu1 %vm149_vm4, %v3201_v25 }
  0xc1   : > { %v3207_v26 = vpop.trf.xlu0 }
  0xc2   : > { %2362 = vmatmul.mubr.msk.f32.gmra.mxu0 %vm149_vm4, %v3207_v26  ;;  %2388 = vmatmul.mubr.msk.f32.gmra.mxu1 %vm149_vm4, %v3207_v26 }
  0xc5   : > { %v3213_v27 = vpop.trf.xlu0 }
  0xc6   : > { %2364 = vmatprep.mubr.msk.f32.mxu0 %vm149_vm4, %v3213_v27  ;;  %2390 = vmatprep.mubr.msk.f32.mxu1 %vm149_vm4, %v3213_v27 }
  0xc9   : > { %v3219_v28 = vpop.trf.xlu0 }
  0xca   : > { %2365 = vmatmul.mubr.msk.f32.gmra.mxu0 %vm149_vm4, %v3219_v28  ;;  %2391 = vmatmul.mubr.msk.f32.gmra.mxu1 %vm149_vm4, %v3219_v28 }
  0xcd   : > { %v3225_v29 = vpop.trf.xlu0 }
  0xce   : > { %2367 = vmatprep.mubr.msk.f32.mxu0 %vm149_vm4, %v3225_v29  ;;  %2393 = vmatprep.mubr.msk.f32.mxu1 %vm149_vm4, %v3225_v29 }
  0xd1   : > { %v3231_v30 = vpop.trf.xlu0 }
  0xd2   : > { %2368 = vmatmul.mubr.msk.f32.gmra.mxu0 %vm149_vm4, %v3231_v30  ;;  %2394 = vmatmul.mubr.msk.f32.gmra.mxu1 %vm149_vm4, %v3231_v30 }
  0xd5   : > { %v3237_v31 = vpop.trf.xlu0 }
  0xd6   : > { %2370 = vmatprep.mubr.msk.f32.mxu0 %vm149_vm4, %v3237_v31  ;;  %2396 = vmatprep.mubr.msk.f32.mxu1 %vm149_vm4, %v3237_v31 }
  0xd9   : > { %v3243_v32 = vpop.trf.xlu0 }
  0xda   : > { %2371 = vmatmul.mubr.msk.f32.gmra.mxu0 %vm149_vm4, %v3243_v32  ;;  %2397 = vmatmul.mubr.msk.f32.gmra.mxu1 %vm149_vm4, %v3243_v32 }
  0xdd   : > { %v3249_v33 = vpop.trf.xlu0 }
  0xde   : > { %2373 = vmatprep.mubr.msk.f32.mxu0 %vm149_vm4, %v3249_v33  ;;  %2399 = vmatprep.mubr.msk.f32.mxu1 %vm149_vm4, %v3249_v33 }
  0xe1   : > { %v3255_v34 = vpop.trf.xlu0 }
  0xe2   : > { %2374 = vmatmul.mubr.msk.f32.gmra.mxu0 %vm149_vm4, %v3255_v34  ;;  %2400 = vmatmul.mubr.msk.f32.gmra.mxu1 %vm149_vm4, %v3255_v34 }
  0xe5   : > { %v3261_v35 = vpop.trf.xlu0 }
  0xe6   : > { %2376 = vmatprep.mubr.msk.f32.mxu0 %vm149_vm4, %v3261_v35  ;;  %2402 = vmatprep.mubr.msk.f32.mxu1 %vm149_vm4, %v3261_v35 }
  0xe9   : > { %v3267_v36 = vpop.trf.xlu0 }
  0xea   : > { %2377 = vmatmul.mubr.msk.f32.gmra.mxu0 %vm149_vm4, %v3267_v36  ;;  %2403 = vmatmul.mubr.msk.f32.gmra.mxu1 %vm149_vm4, %v3267_v36 }
  0xeb   : > { %2407 = vmatprep.mubr.msk.f32.mxu0 %vm149_vm4, %v3167_v21  ;;  %2433 = vmatprep.mubr.msk.f32.mxu1 %vm149_vm4, %v3167_v21 }
  0xee   : > { %2408 = vmatmul.mubr.msk.f32.vlgmr.msra.gmra.mxu0 %vm149_vm4, %v3173_v22  ;;  %2434 = vmatmul.mubr.msk.f32.vlgmr.msra.gmra.mxu1 %vm149_vm4, %v3173_v22 }
  0xef   : > { %2458 = vmatpush3.msk.msra.mxu0 %vm927_vm5, %v3022_v20  ;;  %2410 = vmatprep.mubr.msk.f32.mxu0 %vm149_vm4, %v3189_v23 }
  0xf0   : > { %2436 = vmatprep.mubr.msk.f32.mxu1 %vm149_vm4, %v3189_v23  ;;  %2484 = vmatpush3.msk.msra.mxu1 %vm1111_vm6, %v3022_v20 }
  0xf1   : > { %2509 = vmatprep.subr.msk.mxu0 %vm1295_vm7, %v3022_v20  ;;  %2535 = vmatprep.subr.msk.mxu1 %vm1479_vm8, %v3022_v20 }
  0xf2   : > { %2411 = vmatmul.mubr.msk.f32.gmra.mxu0 %vm149_vm4, %v3195_v24  ;;  %2437 = vmatmul.mubr.msk.f32.gmra.mxu1 %vm149_vm4, %v3195_v24 }
  0xf3   : > { %2413 = vmatprep.mubr.msk.f32.mxu0 %vm149_vm4, %v3201_v25  ;;  %2439 = vmatprep.mubr.msk.f32.mxu1 %vm149_vm4, %v3201_v25 }
  0xf6   : > { %2414 = vmatmul.mubr.msk.f32.gmra.mxu0 %vm149_vm4, %v3207_v26  ;;  %2440 = vmatmul.mubr.msk.f32.gmra.mxu1 %vm149_vm4, %v3207_v26 }
  0xf7   : > { %2416 = vmatprep.mubr.msk.f32.mxu0 %vm149_vm4, %v3213_v27  ;;  %2442 = vmatprep.mubr.msk.f32.mxu1 %vm149_vm4, %v3213_v27 }
  0xfa   : > { %2417 = vmatmul.mubr.msk.f32.gmra.mxu0 %vm149_vm4, %v3219_v28  ;;  %2443 = vmatmul.mubr.msk.f32.gmra.mxu1 %vm149_vm4, %v3219_v28 }
  0xfb   : > { %2419 = vmatprep.mubr.msk.f32.mxu0 %vm149_vm4, %v3225_v29  ;;  %2445 = vmatprep.mubr.msk.f32.mxu1 %vm149_vm4, %v3225_v29 }
  0xfe   : > { %2420 = vmatmul.mubr.msk.f32.gmra.mxu0 %vm149_vm4, %v3231_v30  ;;  %2446 = vmatmul.mubr.msk.f32.gmra.mxu1 %vm149_vm4, %v3231_v30 }
  0xff   : > { %2422 = vmatprep.mubr.msk.f32.mxu0 %vm149_vm4, %v3237_v31  ;;  %2448 = vmatprep.mubr.msk.f32.mxu1 %vm149_vm4, %v3237_v31 }
 0x102   : > { %2423 = vmatmul.mubr.msk.f32.gmra.mxu0 %vm149_vm4, %v3243_v32  ;;  %2449 = vmatmul.mubr.msk.f32.gmra.mxu1 %vm149_vm4, %v3243_v32 }
 0x103   : > { %2425 = vmatprep.mubr.msk.f32.mxu0 %vm149_vm4, %v3249_v33  ;;  %2451 = vmatprep.mubr.msk.f32.mxu1 %vm149_vm4, %v3249_v33 }
 0x106   : > { %2426 = vmatmul.mubr.msk.f32.gmra.mxu0 %vm149_vm4, %v3255_v34  ;;  %2452 = vmatmul.mubr.msk.f32.gmra.mxu1 %vm149_vm4, %v3255_v34 }
 0x107   : > { %2428 = vmatprep.mubr.msk.f32.mxu0 %vm149_vm4, %v3261_v35  ;;  %2454 = vmatprep.mubr.msk.f32.mxu1 %vm149_vm4, %v3261_v35 }
 0x10a   : > { %2429 = vmatmul.mubr.msk.f32.gmra.mxu0 %vm149_vm4, %v3267_v36  ;;  %2455 = vmatmul.mubr.msk.f32.gmra.mxu1 %vm149_vm4, %v3267_v36 }
 0x10b   : > { %2459 = vmatprep.mubr.msk.f32.mxu0 %vm149_vm4, %v3167_v21  ;;  %2485 = vmatprep.mubr.msk.f32.mxu1 %vm149_vm4, %v3167_v21 }
 0x10e   : > { %2460 = vmatmul.mubr.msk.f32.vlgmr.msra.gmra.mxu0 %vm149_vm4, %v3173_v22  ;;  %2486 = vmatmul.mubr.msk.f32.vlgmr.msra.gmra.mxu1 %vm149_vm4, %v3173_v22 }
 0x10f   : > { %2510 = vmatpush3.msk.msra.mxu0 %vm1295_vm7, %v3022_v20  ;;  %2462 = vmatprep.mubr.msk.f32.mxu0 %vm149_vm4, %v3189_v23 }
 0x110   : > { %2488 = vmatprep.mubr.msk.f32.mxu1 %vm149_vm4, %v3189_v23  ;;  %2536 = vmatpush3.msk.msra.mxu1 %vm1479_vm8, %v3022_v20 }
 0x112   : > { %2463 = vmatmul.mubr.msk.f32.gmra.mxu0 %vm149_vm4, %v3195_v24  ;;  %2489 = vmatmul.mubr.msk.f32.gmra.mxu1 %vm149_vm4, %v3195_v24 }
 0x113   : > { %2465 = vmatprep.mubr.msk.f32.mxu0 %vm149_vm4, %v3201_v25  ;;  %2491 = vmatprep.mubr.msk.f32.mxu1 %vm149_vm4, %v3201_v25 }
 0x116   : > { %2466 = vmatmul.mubr.msk.f32.gmra.mxu0 %vm149_vm4, %v3207_v26  ;;  %2492 = vmatmul.mubr.msk.f32.gmra.mxu1 %vm149_vm4, %v3207_v26 }
 0x117   : > { %2468 = vmatprep.mubr.msk.f32.mxu0 %vm149_vm4, %v3213_v27  ;;  %2494 = vmatprep.mubr.msk.f32.mxu1 %vm149_vm4, %v3213_v27 }
 0x11a   : > { %2469 = vmatmul.mubr.msk.f32.gmra.mxu0 %vm149_vm4, %v3219_v28  ;;  %2495 = vmatmul.mubr.msk.f32.gmra.mxu1 %vm149_vm4, %v3219_v28 }
 0x11b   : > { %2471 = vmatprep.mubr.msk.f32.mxu0 %vm149_vm4, %v3225_v29  ;;  %2497 = vmatprep.mubr.msk.f32.mxu1 %vm149_vm4, %v3225_v29 }
 0x11e   : > { %2472 = vmatmul.mubr.msk.f32.gmra.mxu0 %vm149_vm4, %v3231_v30  ;;  %2498 = vmatmul.mubr.msk.f32.gmra.mxu1 %vm149_vm4, %v3231_v30 }
 0x11f   : > { %2474 = vmatprep.mubr.msk.f32.mxu0 %vm149_vm4, %v3237_v31  ;;  %2500 = vmatprep.mubr.msk.f32.mxu1 %vm149_vm4, %v3237_v31 }
 0x122   : > { %2475 = vmatmul.mubr.msk.f32.gmra.mxu0 %vm149_vm4, %v3243_v32  ;;  %2501 = vmatmul.mubr.msk.f32.gmra.mxu1 %vm149_vm4, %v3243_v32 }
 0x123   : > { %2477 = vmatprep.mubr.msk.f32.mxu0 %vm149_vm4, %v3249_v33  ;;  %2503 = vmatprep.mubr.msk.f32.mxu1 %vm149_vm4, %v3249_v33 }
 0x126   : > { %2478 = vmatmul.mubr.msk.f32.gmra.mxu0 %vm149_vm4, %v3255_v34  ;;  %2504 = vmatmul.mubr.msk.f32.gmra.mxu1 %vm149_vm4, %v3255_v34 }
 0x127   : > { %2480 = vmatprep.mubr.msk.f32.mxu0 %vm149_vm4, %v3261_v35  ;;  %2506 = vmatprep.mubr.msk.f32.mxu1 %vm149_vm4, %v3261_v35 }
 0x12a   : > { %2481 = vmatmul.mubr.msk.f32.gmra.mxu0 %vm149_vm4, %v3267_v36  ;;  %2507 = vmatmul.mubr.msk.f32.gmra.mxu1 %vm149_vm4, %v3267_v36 }
 0x12b   : > { %2511 = vmatprep.mubr.msk.f32.mxu0 %vm149_vm4, %v3167_v21  ;;  %2537 = vmatprep.mubr.msk.f32.mxu1 %vm149_vm4, %v3167_v21 }
 0x12e   : > { %2512 = vmatmul.mubr.msk.f32.vlgmr.msra.gmra.mxu0 %vm149_vm4, %v3173_v22  ;;  %2538 = vmatmul.mubr.msk.f32.vlgmr.msra.gmra.mxu1 %vm149_vm4, %v3173_v22 }
 0x12f   : > { %2514 = vmatprep.mubr.msk.f32.mxu0 %vm149_vm4, %v3189_v23  ;;  %2540 = vmatprep.mubr.msk.f32.mxu1 %vm149_vm4, %v3189_v23 }
 0x132   : > { %2515 = vmatmul.mubr.msk.f32.gmra.mxu0 %vm149_vm4, %v3195_v24  ;;  %2541 = vmatmul.mubr.msk.f32.gmra.mxu1 %vm149_vm4, %v3195_v24 }
 0x133   : > { %2517 = vmatprep.mubr.msk.f32.mxu0 %vm149_vm4, %v3201_v25  ;;  %2543 = vmatprep.mubr.msk.f32.mxu1 %vm149_vm4, %v3201_v25 }
 0x136   : > { %2518 = vmatmul.mubr.msk.f32.gmra.mxu0 %vm149_vm4, %v3207_v26  ;;  %2544 = vmatmul.mubr.msk.f32.gmra.mxu1 %vm149_vm4, %v3207_v26 }
 0x137   : > { %2520 = vmatprep.mubr.msk.f32.mxu0 %vm149_vm4, %v3213_v27  ;;  %2546 = vmatprep.mubr.msk.f32.mxu1 %vm149_vm4, %v3213_v27 }
 0x13a   : > { %2521 = vmatmul.mubr.msk.f32.gmra.mxu0 %vm149_vm4, %v3219_v28  ;;  %2547 = vmatmul.mubr.msk.f32.gmra.mxu1 %vm149_vm4, %v3219_v28 }
 0x13b   : > { %2523 = vmatprep.mubr.msk.f32.mxu0 %vm149_vm4, %v3225_v29  ;;  %2549 = vmatprep.mubr.msk.f32.mxu1 %vm149_vm4, %v3225_v29 }
 0x13e   : > { %2524 = vmatmul.mubr.msk.f32.gmra.mxu0 %vm149_vm4, %v3231_v30  ;;  %2550 = vmatmul.mubr.msk.f32.gmra.mxu1 %vm149_vm4, %v3231_v30 }
 0x13f   : > { %2526 = vmatprep.mubr.msk.f32.mxu0 %vm149_vm4, %v3237_v31  ;;  %2552 = vmatprep.mubr.msk.f32.mxu1 %vm149_vm4, %v3237_v31 }
 0x142   : > { %2527 = vmatmul.mubr.msk.f32.gmra.mxu0 %vm149_vm4, %v3243_v32  ;;  %2553 = vmatmul.mubr.msk.f32.gmra.mxu1 %vm149_vm4, %v3243_v32 }
 0x143   : > { %2529 = vmatprep.mubr.msk.f32.mxu0 %vm149_vm4, %v3249_v33  ;;  %2555 = vmatprep.mubr.msk.f32.mxu1 %vm149_vm4, %v3249_v33 }
 0x146   : > { %2530 = vmatmul.mubr.msk.f32.gmra.mxu0 %vm149_vm4, %v3255_v34  ;;  %2556 = vmatmul.mubr.msk.f32.gmra.mxu1 %vm149_vm4, %v3255_v34 }
 0x147   : > { %2532 = vmatprep.mubr.msk.f32.mxu0 %vm149_vm4, %v3261_v35  ;;  %2558 = vmatprep.mubr.msk.f32.mxu1 %vm149_vm4, %v3261_v35 }
 0x14a   : > { %2533 = vmatmul.mubr.msk.f32.gmra.mxu0 %vm149_vm4, %v3267_v36  ;;  %2559 = vmatmul.mubr.msk.f32.gmra.mxu1 %vm149_vm4, %v3267_v36 }
 0x172   : > { %v2357_v42 = vpop.f32.mrf.mxu0  ;;  %v2383_v43 = vpop.f32.mrf.mxu1 }
 0x173   : > { %v270_v44 = vadd.f32 %v2357_v42, %v3492_v40  ;;  %v454_v45 = vadd.f32 %v2383_v43, %v3495_v41 }
 0x174   : > { %v264_v46 = vpop.f32.mrf.mxu0  ;;  %v448_v47 = vpop.f32.mrf.mxu1 }
 0x175   : > { %v344_v48 = vmax.f32 %v270_v44, 0.0  ;;  %v265_v49 = vadd.f32 %v264_v46, %v3492_v40  ;;  %v449_v50 = vadd.f32 %v448_v47, %v3495_v41  ;;  %v528_v52 = vmax.f32 %v454_v45, 0.0 }
 0x177   : > { %v360_v51 = vadd.f32 %v3006_v15, %v344_v48  ;;  %v343_v53 = vmax.f32 %v265_v49, 0.0  ;;  %v527_v56 = vmax.f32 %v449_v50, 0.0 }
 0x179   : > { %v3502_v54 = vadd.f32 %v528_v52, %v360_v51  ;;  %v359_v55 = vadd.f32 %v3010_v16, %v343_v53 }
 0x17a   : > { %v2360_v57 = vpop.f32.mrf.mxu0  ;;  %v2386_v58 = vpop.f32.mrf.mxu1 }
 0x17b   : > { %v3505_v59 = vadd.f32 %v527_v56, %v359_v55  ;;  %v280_v60 = vadd.f32 %v2360_v57, %v3492_v40  ;;  %v464_v61 = vadd.f32 %v2386_v58, %v3495_v41 }
 0x17c   : > { %v274_v62 = vpop.f32.mrf.mxu0  ;;  %v458_v63 = vpop.f32.mrf.mxu1 }
 0x17d   : > { %v346_v0 = vmax.f32 %v280_v60, 0.0  ;;  %v275_v15 = vadd.f32 %v274_v62, %v3492_v40  ;;  %v459_v17 = vadd.f32 %v458_v63, %v3495_v41  ;;  %v530_v20 = vmax.f32 %v464_v61, 0.0 }
 0x17f   : > { %v362_v19 = vadd.f32 %v2998_v13, %v346_v0  ;;  %v345_v16 = vmax.f32 %v275_v15, 0.0  ;;  %v529_v23 = vmax.f32 %v459_v17, 0.0 }
 0x181   : > { %v3512_v21 = vadd.f32 %v530_v20, %v362_v19  ;;  %v361_v22 = vadd.f32 %v3002_v14, %v345_v16 }
 0x182   : > { %v2363_v24 = vpop.f32.mrf.mxu0  ;;  %v2389_v25 = vpop.f32.mrf.mxu1 }
 0x183   : > { %v3515_v26 = vadd.f32 %v529_v23, %v361_v22  ;;  %v290_v27 = vadd.f32 %v2363_v24, %v3492_v40  ;;  %v474_v28 = vadd.f32 %v2389_v25, %v3495_v41 }
 0x184   : > { %v284_v29 = vpop.f32.mrf.mxu0  ;;  %v468_v30 = vpop.f32.mrf.mxu1 }
 0x185   : > { %v348_v31 = vmax.f32 %v290_v27, 0.0  ;;  %v285_v13 = vadd.f32 %v284_v29, %v3492_v40  ;;  %v469_v32 = vadd.f32 %v468_v30, %v3495_v41  ;;  %v532_v34 = vmax.f32 %v474_v28, 0.0 }
 0x187   : > { %v364_v33 = vadd.f32 %v2990_v11, %v348_v31  ;;  %v347_v14 = vmax.f32 %v285_v13, 0.0  ;;  %v531_v37 = vmax.f32 %v469_v32, 0.0 }
 0x189   : > { %v3522_v35 = vadd.f32 %v532_v34, %v364_v33  ;;  %v363_v36 = vadd.f32 %v2994_v12, %v347_v14 }
 0x18a   : > { %v2366_v38 = vpop.f32.mrf.mxu0  ;;  %v2392_v42 = vpop.f32.mrf.mxu1 }
 0x18b   : > { %v3525_v43 = vadd.f32 %v531_v37, %v363_v36  ;;  %v300_v44 = vadd.f32 %v2366_v38, %v3492_v40  ;;  %v484_v45 = vadd.f32 %v2392_v42, %v3495_v41 }
 0x18c   : > { %v294_v46 = vpop.f32.mrf.mxu0  ;;  %v478_v47 = vpop.f32.mrf.mxu1 }
 0x18d   : > { %v350_v48 = vmax.f32 %v300_v44, 0.0  ;;  %v295_v11 = vadd.f32 %v294_v46, %v3492_v40  ;;  %v479_v49 = vadd.f32 %v478_v47, %v3495_v41  ;;  %v534_v51 = vmax.f32 %v484_v45, 0.0 }
 0x18f   : > { %v366_v50 = vadd.f32 %v2982_v9, %v350_v48  ;;  %v349_v12 = vmax.f32 %v295_v11, 0.0  ;;  %v533_v55 = vmax.f32 %v479_v49, 0.0  ;;  %v564_v49 = vsub.s32 2, %v3153_v18 }
 0x191   : > { %v3532_v52 = vadd.f32 %v534_v51, %v366_v50  ;;  %v365_v53 = vadd.f32 %v2986_v10, %v349_v12  ;;  %v748_v12 = vsub.s32 3, %v3153_v18 }
 0x192   : > { %v2369_v56 = vpop.f32.mrf.mxu0  ;;  %v2395_v57 = vpop.f32.mrf.mxu1 }
 0x193   : > { %v3535_v58 = vadd.f32 %v533_v55, %v365_v53  ;;  %v310_v60 = vadd.f32 %v2369_v56, %v3492_v40  ;;  %v494_v61 = vadd.f32 %v2395_v57, %v3495_v41 }
 0x194   : > { %v304_v62 = vpop.f32.mrf.mxu0  ;;  %v488_v63 = vpop.f32.mrf.mxu1 }
 0x195   : > { %v352_v0 = vmax.f32 %v310_v60, 0.0  ;;  %v305_v9 = vadd.f32 %v304_v62, %v3492_v40  ;;  %v489_v15 = vadd.f32 %v488_v63, %v3495_v41  ;;  %v536_v19 = vmax.f32 %v494_v61, 0.0 }
 0x196   : > { %v3568_v61 = vrot.slane %v3489_v39, %v564_v49 }
 0x197   : > { %v368_v17 = vadd.f32 %v2974_v7, %v352_v0  ;;  %v351_v10 = vmax.f32 %v305_v9, 0.0  ;;  %v535_v22 = vmax.f32 %v489_v15, 0.0  ;;  %v3575_v15 = vrot.slane %v3489_v39, %v748_v12 }
 0x199   : > { %v3542_v20 = vadd.f32 %v536_v19, %v368_v17  ;;  %v367_v16 = vadd.f32 %v2978_v8, %v351_v10 }
 0x19a   : > { %v2372_v23 = vpop.f32.mrf.mxu0  ;;  %v2398_v24 = vpop.f32.mrf.mxu1 }
 0x19b   : > { %v3545_v25 = vadd.f32 %v535_v22, %v367_v16  ;;  %v320_v27 = vadd.f32 %v2372_v23, %v3492_v40  ;;  %v504_v28 = vadd.f32 %v2398_v24, %v3495_v41 }
 0x19c   : > { %v314_v29 = vpop.f32.mrf.mxu0  ;;  %v498_v30 = vpop.f32.mrf.mxu1 }
 0x19d   : > { %v354_v31 = vmax.f32 %v320_v27, 0.0  ;;  %v315_v7 = vadd.f32 %v314_v29, %v3492_v40  ;;  %v499_v13 = vadd.f32 %v498_v30, %v3495_v41  ;;  %v538_v33 = vmax.f32 %v504_v28, 0.0 }
 0x19f   : > { %v370_v32 = vadd.f32 %v2966_v5, %v354_v31  ;;  %v353_v8 = vmax.f32 %v315_v7, 0.0  ;;  %v537_v36 = vmax.f32 %v499_v13, 0.0 }
 0x1a1   : > { %v3552_v34 = vadd.f32 %v538_v33, %v370_v32  ;;  %v369_v14 = vadd.f32 %v2970_v6, %v353_v8 }
 0x1a2   : > { %v2375_v37 = vpop.f32.mrf.mxu0  ;;  %v2401_v38 = vpop.f32.mrf.mxu1 }
 0x1a3   : > { %v3555_v42 = vadd.f32 %v537_v36, %v369_v14  ;;  %v330_v44 = vadd.f32 %v2375_v37, %v3492_v40  ;;  %v514_v45 = vadd.f32 %v2401_v38, %v3495_v41 }
 0x1a4   : > { %v324_v46 = vpop.f32.mrf.mxu0  ;;  %v508_v47 = vpop.f32.mrf.mxu1 }
 0x1a5   : > { %v356_v48 = vmax.f32 %v330_v44, 0.0  ;;  %v325_v5 = vadd.f32 %v324_v46, %v3492_v40  ;;  %v509_v11 = vadd.f32 %v508_v47, %v3495_v41  ;;  %v540_v50 = vmax.f32 %v514_v45, 0.0 }
 0x1a7   : > { %v372_v6 = vadd.f32 %v2958_v3, %v356_v48  ;;  %v355_v51 = vmax.f32 %v325_v5, 0.0  ;;  %v539_v56 = vmax.f32 %v509_v11, 0.0 }
 0x1a9   : > { %v3564_v53 = vadd.f32 %v540_v50, %v372_v6  ;;  %v371_v55 = vadd.f32 %v2962_v4, %v355_v51 }
 0x1aa   : > { %v2378_v57 = vpop.f32.mrf.mxu0  ;;  %v2404_v60 = vpop.f32.mrf.mxu1 }
 0x1ab   : > { %v3570_v62 = vadd.f32 %v539_v56, %v371_v55  ;;  %v340_v63 = vadd.f32 %v2378_v57, %v3492_v40  ;;  %v524_v3 = vadd.f32 %v2404_v60, %v3495_v41 }
 0x1ac   : > { %v334_v0 = vpop.f32.mrf.mxu0  ;;  %v518_v9 = vpop.f32.mrf.mxu1 }
 0x1ad   : > { %v358_v17 = vmax.f32 %v340_v63, 0.0  ;;  %v335_v4 = vadd.f32 %v334_v0, %v3492_v40  ;;  %v519_v19 = vadd.f32 %v518_v9, %v3495_v41  ;;  %v542_v23 = vmax.f32 %v524_v3, 0.0 }
 0x1ae   : > { %v2409_v10 = vpop.f32.mrf.mxu0  ;;  %v2435_v16 = vpop.f32.mrf.mxu1 }
 0x1af   : > { %v374_v22 = vadd.f32 %v2950_v1, %v358_v17  ;;  %v357_v24 = vmax.f32 %v335_v4, 0.0  ;;  %v638_v27 = vadd.f32 %v2409_v10, %v3568_v61  ;;  %v541_v28 = vmax.f32 %v519_v19, 0.0 }
 0x1b0   : > { %v822_v29 = vadd.f32 %v2435_v16, %v3575_v15  ;;  %v632_v30 = vpop.f32.mrf.mxu0  ;;  %v816_v31 = vpop.f32.mrf.mxu1 }
 0x1b1   : > { %v3582_v7 = vadd.f32 %v542_v23, %v374_v22  ;;  %v373_v13 = vadd.f32 %v2954_v2, %v357_v24  ;;  %v712_v40 = vmax.f32 %v638_v27, 0.0  ;;  %v633_v41 = vadd.f32 %v632_v30, %v3568_v61 }
 0x1b2   : > { %v896_v32 = vmax.f32 %v822_v29, 0.0  ;;  %v817_v33 = vadd.f32 %v816_v31, %v3575_v15  ;;  %v2412_v1 = vpop.f32.mrf.mxu0  ;;  %v2438_v8 = vpop.f32.mrf.mxu1 }
 0x1b3   : > { %v3587_v14 = vadd.f32 %v541_v28, %v373_v13  ;;  %v728_v36 = vadd.f32 %v712_v40, %v3502_v54  ;;  %v711_v37 = vmax.f32 %v633_v41, 0.0  ;;  %v648_v38 = vadd.f32 %v2412_v1, %v3568_v61 }
 0x1b4   : > { %v895_v44 = vmax.f32 %v817_v33, 0.0  ;;  %v832_v45 = vadd.f32 %v2438_v8, %v3575_v15  ;;  %v642_v46 = vpop.f32.mrf.mxu0  ;;  %v826_v2 = vpop.f32.mrf.mxu1 }
 0x1b5   : > { %v3592_v47 = vadd.f32 %v896_v32, %v728_v36  ;;  %v727_v48 = vadd.f32 %v711_v37, %v3505_v59  ;;  %v714_v5 = vmax.f32 %v648_v38, 0.0  ;;  %v643_v11 = vadd.f32 %v642_v46, %v3568_v61 }
 0x1b6   : > { %v898_v49 = vmax.f32 %v832_v45, 0.0  ;;  %v827_v6 = vadd.f32 %v826_v2, %v3575_v15  ;;  %v2415_v50 = vpop.f32.mrf.mxu0  ;;  %v2441_v54 = vpop.f32.mrf.mxu1 }
 0x1b7   : > { %v3597_v51 = vadd.f32 %v895_v44, %v727_v48  ;;  %v730_v12 = vadd.f32 %v714_v5, %v3512_v21  ;;  %v713_v55 = vmax.f32 %v643_v11, 0.0  ;;  %v658_v56 = vadd.f32 %v2415_v50, %v3568_v61 }
 0x1b8   : > { %v897_v57 = vmax.f32 %v827_v6, 0.0  ;;  %v842_v60 = vadd.f32 %v2441_v54, %v3575_v15  ;;  %v652_v63 = vpop.f32.mrf.mxu0  ;;  %v836_v59 = vpop.f32.mrf.mxu1 }
 0x1b9   : > { %v3602_v3 = vadd.f32 %v898_v49, %v730_v12  ;;  %v729_v0 = vadd.f32 %v713_v55, %v3515_v26  ;;  %v716_v9 = vmax.f32 %v658_v56, 0.0  ;;  %v653_v17 = vadd.f32 %v652_v63, %v3568_v61 }
 0x1ba   : > { %v900_v4 = vmax.f32 %v842_v60, 0.0  ;;  %v837_v19 = vadd.f32 %v836_v59, %v3575_v15  ;;  %v2418_v10 = vpop.f32.mrf.mxu0  ;;  %v2444_v21 = vpop.f32.mrf.mxu1 }
 0x1bb   : > { %v3607_v16 = vadd.f32 %v897_v57, %v729_v0  ;;  %v732_v22 = vadd.f32 %v716_v9, %v3522_v35  ;;  %v715_v23 = vmax.f32 %v653_v17, 0.0  ;;  %v668_v24 = vadd.f32 %v2418_v10, %v3568_v61 }
 0x1bc   : > { %v899_v27 = vmax.f32 %v837_v19, 0.0  ;;  %v852_v28 = vadd.f32 %v2444_v21, %v3575_v15  ;;  %v662_v29 = vpop.f32.mrf.mxu0  ;;  %v846_v26 = vpop.f32.mrf.mxu1  ;;  %v932_v10 = vsub.s32 4, %v3153_v18 }
 0x1bd   : > { %v3612_v30 = vadd.f32 %v900_v4, %v732_v22  ;;  %v731_v31 = vadd.f32 %v715_v23, %v3525_v43  ;;  %v718_v13 = vmax.f32 %v668_v24, 0.0  ;;  %v663_v40 = vadd.f32 %v662_v29, %v3568_v61 }
 0x1be   : > { %v902_v41 = vmax.f32 %v852_v28, 0.0  ;;  %v847_v32 = vadd.f32 %v846_v26, %v3575_v15  ;;  %v2421_v33 = vpop.f32.mrf.mxu0  ;;  %v2447_v35 = vpop.f32.mrf.mxu1  ;;  %v1116_v26 = vsub.s32 5, %v3153_v18 }
 0x1bf   : > { %v3617_v1 = vadd.f32 %v899_v27, %v731_v31  ;;  %v734_v8 = vadd.f32 %v718_v13, %v3532_v52  ;;  %v717_v36 = vmax.f32 %v663_v40, 0.0  ;;  %v678_v37 = vadd.f32 %v2421_v33, %v3568_v61 }
 0x1c0   : > { %v901_v38 = vmax.f32 %v847_v32, 0.0  ;;  %v862_v44 = vadd.f32 %v2447_v35, %v3575_v15  ;;  %v672_v45 = vpop.f32.mrf.mxu0  ;;  %v856_v43 = vpop.f32.mrf.mxu1 }
 0x1c1   : > { %v3622_v46 = vadd.f32 %v902_v41, %v734_v8  ;;  %v733_v2 = vadd.f32 %v717_v36, %v3535_v58  ;;  %v720_v48 = vmax.f32 %v678_v37, 0.0  ;;  %v673_v5 = vadd.f32 %v672_v45, %v3568_v61 }
 0x1c2   : > { %v904_v11 = vmax.f32 %v862_v44, 0.0  ;;  %v857_v49 = vadd.f32 %v856_v43, %v3575_v15  ;;  %v2424_v6 = vpop.f32.mrf.mxu0  ;;  %v2450_v52 = vpop.f32.mrf.mxu1  ;;  %v3650_v8 = vrot.slane %v3489_v39, %v932_v10 }
 0x1c3   : > { %v3627_v50 = vadd.f32 %v901_v38, %v733_v2  ;;  %v736_v54 = vadd.f32 %v720_v48, %v3542_v20  ;;  %v719_v12 = vmax.f32 %v673_v5, 0.0  ;;  %v688_v55 = vadd.f32 %v2424_v6, %v3568_v61 }
 0x1c4   : > { %v903_v56 = vmax.f32 %v857_v49, 0.0  ;;  %v872_v57 = vadd.f32 %v2450_v52, %v3575_v15  ;;  %v682_v60 = vpop.f32.mrf.mxu0  ;;  %v866_v58 = vpop.f32.mrf.mxu1  ;;  %v3658_v48 = vrot.slane %v3489_v39, %v1116_v26 }
 0x1c5   : > { %v3632_v63 = vadd.f32 %v904_v11, %v736_v54  ;;  %v735_v59 = vadd.f32 %v719_v12, %v3545_v25  ;;  %v722_v0 = vmax.f32 %v688_v55, 0.0  ;;  %v683_v9 = vadd.f32 %v682_v60, %v3568_v61 }
 0x1c6   : > { %v906_v17 = vmax.f32 %v872_v57, 0.0  ;;  %v867_v4 = vadd.f32 %v866_v58, %v3575_v15  ;;  %v2427_v19 = vpop.f32.mrf.mxu0  ;;  %v2453_v20 = vpop.f32.mrf.mxu1 }
 0x1c7   : > { %v3638_v21 = vadd.f32 %v903_v56, %v735_v59  ;;  %v738_v22 = vadd.f32 %v722_v0, %v3552_v34  ;;  %v721_v23 = vmax.f32 %v683_v9, 0.0  ;;  %v698_v24 = vadd.f32 %v2427_v19, %v3568_v61 }
 0x1c8   : > { %v905_v27 = vmax.f32 %v867_v4, 0.0  ;;  %v882_v25 = vadd.f32 %v2453_v20, %v3575_v15  ;;  %v692_v28 = vpop.f32.mrf.mxu0  ;;  %v876_v29 = vpop.f32.mrf.mxu1 }
 0x1c9   : > { %v3644_v31 = vadd.f32 %v906_v17, %v738_v22  ;;  %v737_v13 = vadd.f32 %v721_v23, %v3555_v42  ;;  %v724_v40 = vmax.f32 %v698_v24, 0.0  ;;  %v693_v41 = vadd.f32 %v692_v28, %v3568_v61 }
 0x1ca   : > { %v908_v32 = vmax.f32 %v882_v25, 0.0  ;;  %v877_v34 = vadd.f32 %v876_v29, %v3575_v15  ;;  %v2430_v33 = vpop.f32.mrf.mxu0  ;;  %v2456_v35 = vpop.f32.mrf.mxu1 }
 0x1cb   : > { %v3652_v36 = vadd.f32 %v905_v27, %v737_v13  ;;  %v740_v37 = vadd.f32 %v724_v40, %v3564_v53  ;;  %v723_v38 = vmax.f32 %v693_v41, 0.0  ;;  %v708_v44 = vadd.f32 %v2430_v33, %v3568_v61 }
 0x1cc   : > { %v907_v45 = vmax.f32 %v877_v34, 0.0  ;;  %v892_v42 = vadd.f32 %v2456_v35, %v3575_v15  ;;  %v702_v43 = vpop.f32.mrf.mxu0  ;;  %v886_v2 = vpop.f32.mrf.mxu1 }
 0x1cd   : > { %v3660_v5 = vadd.f32 %v908_v32, %v740_v37  ;;  %v739_v11 = vadd.f32 %v723_v38, %v3570_v62  ;;  %v726_v49 = vmax.f32 %v708_v44, 0.0  ;;  %v703_v6 = vadd.f32 %v702_v43, %v3568_v61 }
 0x1ce   : > { %v910_v52 = vmax.f32 %v892_v42, 0.0  ;;  %v887_v53 = vadd.f32 %v886_v2, %v3575_v15  ;;  %v2461_v54 = vpop.f32.mrf.mxu0  ;;  %v2487_v12 = vpop.f32.mrf.mxu1 }
 0x1cf   : > { %v3665_v55 = vadd.f32 %v907_v45, %v739_v11  ;;  %v742_v56 = vadd.f32 %v726_v49, %v3582_v7  ;;  %v725_v57 = vmax.f32 %v703_v6, 0.0  ;;  %v1006_v60 = vadd.f32 %v2461_v54, %v3650_v8 }
 0x1d0   : > { %v909_v58 = vmax.f32 %v887_v53, 0.0  ;;  %v1190_v59 = vadd.f32 %v2487_v12, %v3658_v48  ;;  %v1000_v0 = vpop.f32.mrf.mxu0  ;;  %v1184_v62 = vpop.f32.mrf.mxu1 }
 0x1d1   : > { %v3670_v9 = vadd.f32 %v910_v52, %v742_v56  ;;  %v741_v61 = vadd.f32 %v725_v57, %v3587_v14  ;;  %v1080_v17 = vmax.f32 %v1006_v60, 0.0  ;;  %v1001_v15 = vadd.f32 %v1000_v0, %v3650_v8 }
 0x1d2   : > { %v1264_v4 = vmax.f32 %v1190_v59, 0.0  ;;  %v1185_v19 = vadd.f32 %v1184_v62, %v3658_v48  ;;  %v2464_v20 = vpop.f32.mrf.mxu0  ;;  %v2490_v7 = vpop.f32.mrf.mxu1 }
 0x1d3   : > { %v3675_v10 = vadd.f32 %v909_v58, %v741_v61  ;;  %v1096_v22 = vadd.f32 %v1080_v17, %v3592_v47  ;;  %v1079_v23 = vmax.f32 %v1001_v15, 0.0  ;;  %v1016_v24 = vadd.f32 %v2464_v20, %v3650_v8 }
 0x1d4   : > { %v1263_v27 = vmax.f32 %v1185_v19, 0.0  ;;  %v1200_v25 = vadd.f32 %v2490_v7, %v3658_v48  ;;  %v1010_v28 = vpop.f32.mrf.mxu0  ;;  %v1194_v14 = vpop.f32.mrf.mxu1 }
 0x1d5   : > { %v3680_v29 = vadd.f32 %v1264_v4, %v1096_v22  ;;  %v1095_v26 = vadd.f32 %v1079_v23, %v3597_v51  ;;  %v1082_v13 = vmax.f32 %v1016_v24, 0.0  ;;  %v1011_v40 = vadd.f32 %v1010_v28, %v3650_v8 }
 0x1d6   : > { %v1266_v41 = vmax.f32 %v1200_v25, 0.0  ;;  %v1195_v32 = vadd.f32 %v1194_v14, %v3658_v48  ;;  %v2467_v34 = vpop.f32.mrf.mxu0  ;;  %v2493_v47 = vpop.f32.mrf.mxu1 }
 0x1d7   : > { %v3685_v33 = vadd.f32 %v1263_v27, %v1095_v26  ;;  %v1098_v35 = vadd.f32 %v1082_v13, %v3602_v3  ;;  %v1081_v37 = vmax.f32 %v1011_v40, 0.0  ;;  %v1026_v38 = vadd.f32 %v2467_v34, %v3650_v8 }
 0x1d8   : > { %v1265_v44 = vmax.f32 %v1195_v32, 0.0  ;;  %v1210_v45 = vadd.f32 %v2493_v47, %v3658_v48  ;;  %v1020_v42 = vpop.f32.mrf.mxu0  ;;  %v1204_v51 = vpop.f32.mrf.mxu1 }
 0x1d9   : > { %v3690_v43 = vadd.f32 %v1266_v41, %v1098_v35  ;;  %v1097_v2 = vadd.f32 %v1081_v37, %v3607_v16  ;;  %v1084_v11 = vmax.f32 %v1026_v38, 0.0  ;;  %v1021_v49 = vadd.f32 %v1020_v42, %v3650_v8 }
 0x1da   : > { %v1268_v6 = vmax.f32 %v1210_v45, 0.0  ;;  %v1205_v52 = vadd.f32 %v1204_v51, %v3658_v48  ;;  %v2470_v53 = vpop.f32.mrf.mxu0  ;;  %v2496_v3 = vpop.f32.mrf.mxu1 }
 0x1db   : > { %v3695_v54 = vadd.f32 %v1265_v44, %v1097_v2  ;;  %v1100_v12 = vadd.f32 %v1084_v11, %v3612_v30  ;;  %v1083_v56 = vmax.f32 %v1021_v49, 0.0  ;;  %v1036_v57 = vadd.f32 %v2470_v53, %v3650_v8 }
 0x1dc   : > { %v1267_v60 = vmax.f32 %v1205_v52, 0.0  ;;  %v1220_v58 = vadd.f32 %v2496_v3, %v3658_v48  ;;  %v1030_v59 = vpop.f32.mrf.mxu0  ;;  %v1214_v16 = vpop.f32.mrf.mxu1  ;;  %v1300_v53 = vsub.s32 6, %v3153_v18 }
 0x1dd   : > { %v3700_v0 = vadd.f32 %v1268_v6, %v1100_v12  ;;  %v1099_v62 = vadd.f32 %v1083_v56, %v3617_v1  ;;  %v1086_v61 = vmax.f32 %v1036_v57, 0.0  ;;  %v1031_v17 = vadd.f32 %v1030_v59, %v3650_v8 }
 0x1de   : > { %v1270_v15 = vmax.f32 %v1220_v58, 0.0  ;;  %v1215_v4 = vadd.f32 %v1214_v16, %v3658_v48  ;;  %v2473_v19 = vpop.f32.mrf.mxu0  ;;  %v2499_v30 = vpop.f32.mrf.mxu1  ;;  %v1484_v16 = vsub.s32 7, %v3153_v18 }
 0x1df   : > { %v3705_v20 = vadd.f32 %v1267_v60, %v1099_v62  ;;  %v1102_v7 = vadd.f32 %v1086_v61, %v3622_v46  ;;  %v1085_v22 = vmax.f32 %v1031_v17, 0.0  ;;  %v1046_v23 = vadd.f32 %v2473_v19, %v3650_v8 }
 0x1e0   : > { %v1269_v24 = vmax.f32 %v1215_v4, 0.0  ;;  %v1230_v27 = vadd.f32 %v2499_v30, %v3658_v48  ;;  %v1040_v25 = vpop.f32.mrf.mxu0  ;;  %v1224_v1 = vpop.f32.mrf.mxu1 }
 0x1e1   : > { %v3710_v28 = vadd.f32 %v1270_v15, %v1102_v7  ;;  %v1101_v14 = vadd.f32 %v1085_v22, %v3627_v50  ;;  %v1088_v26 = vmax.f32 %v1046_v23, 0.0  ;;  %v1041_v13 = vadd.f32 %v1040_v25, %v3650_v8 }
 0x1e2   : > { %v1272_v40 = vmax.f32 %v1230_v27, 0.0  ;;  %v1225_v41 = vadd.f32 %v1224_v1, %v3658_v48  ;;  %v2476_v32 = vpop.f32.mrf.mxu0  ;;  %v2502_v46 = vpop.f32.mrf.mxu1  ;;  %v3738_v7 = vrot.slane %v3489_v39, %v1300_v53 }
 0x1e3   : > { %v3715_v34 = vadd.f32 %v1269_v24, %v1101_v14  ;;  %v1104_v47 = vadd.f32 %v1088_v26, %v3632_v63  ;;  %v1087_v35 = vmax.f32 %v1041_v13, 0.0  ;;  %v1056_v37 = vadd.f32 %v2476_v32, %v3650_v8 }
 0x1e4   : > { %v1271_v38 = vmax.f32 %v1225_v41, 0.0  ;;  %v1240_v44 = vadd.f32 %v2502_v46, %v3658_v48  ;;  %v1050_v45 = vpop.f32.mrf.mxu0  ;;  %v1234_v50 = vpop.f32.mrf.mxu1  ;;  %v3746_v14 = vrot.slane %v3489_v39, %v1484_v16 }
 0x1e5   : > { %v3720_v42 = vadd.f32 %v1272_v40, %v1104_v47  ;;  %v1103_v51 = vadd.f32 %v1087_v35, %v3638_v21  ;;  %v1090_v2 = vmax.f32 %v1056_v37, 0.0  ;;  %v1051_v11 = vadd.f32 %v1050_v45, %v3650_v8 }
 0x1e6   : > { %v1274_v49 = vmax.f32 %v1240_v44, 0.0  ;;  %v1235_v6 = vadd.f32 %v1234_v50, %v3658_v48  ;;  %v2479_v52 = vpop.f32.mrf.mxu0  ;;  %v2505_v63 = vpop.f32.mrf.mxu1 }
 0x1e7   : > { %v3726_v3 = vadd.f32 %v1271_v38, %v1103_v51  ;;  %v1106_v12 = vadd.f32 %v1090_v2, %v3644_v31  ;;  %v1089_v56 = vmax.f32 %v1051_v11, 0.0  ;;  %v1066_v57 = vadd.f32 %v2479_v52, %v3650_v8 }
 0x1e8   : > { %v1273_v60 = vmax.f32 %v1235_v6, 0.0  ;;  %v1250_v21 = vadd.f32 %v2505_v63, %v3658_v48  ;;  %v1060_v58 = vpop.f32.mrf.mxu0  ;;  %v1244_v59 = vpop.f32.mrf.mxu1 }
 0x1e9   : > { %v3732_v62 = vadd.f32 %v1274_v49, %v1106_v12  ;;  %v1105_v61 = vadd.f32 %v1089_v56, %v3652_v36  ;;  %v1092_v17 = vmax.f32 %v1066_v57, 0.0  ;;  %v1061_v15 = vadd.f32 %v1060_v58, %v3650_v8 }
 0x1ea   : > { %v1276_v4 = vmax.f32 %v1250_v21, 0.0  ;;  %v1245_v31 = vadd.f32 %v1244_v59, %v3658_v48  ;;  %v2482_v19 = vpop.f32.mrf.mxu0  ;;  %v2508_v30 = vpop.f32.mrf.mxu1 }
 0x1eb   : > { %v3740_v22 = vadd.f32 %v1273_v60, %v1105_v61  ;;  %v1108_v23 = vadd.f32 %v1092_v17, %v3660_v5  ;;  %v1091_v18 = vmax.f32 %v1061_v15, 0.0  ;;  %v1076_v24 = vadd.f32 %v2482_v19, %v3650_v8 }
 0x1ec   : > { %v1275_v27 = vmax.f32 %v1245_v31, 0.0  ;;  %v1260_v36 = vadd.f32 %v2508_v30, %v3658_v48  ;;  %v1070_v25 = vpop.f32.mrf.mxu0  ;;  %v1254_v1 = vpop.f32.mrf.mxu1 }
 0x1ed   : > { %v3748_v26 = vadd.f32 %v1276_v4, %v1108_v23  ;;  %v1107_v13 = vadd.f32 %v1091_v18, %v3665_v55  ;;  %v1094_v40 = vmax.f32 %v1076_v24, 0.0  ;;  %v1071_v41 = vadd.f32 %v1070_v25, %v3650_v8 }
 0x1ee   : > { %v1278_v32 = vmax.f32 %v1260_v36, 0.0  ;;  %v1255_v5 = vadd.f32 %v1254_v1, %v3658_v48  ;;  %v2513_v46 = vpop.f32.mrf.mxu0  ;;  %v2539_v47 = vpop.f32.mrf.mxu1 }
 0x1ef   : > { %v3753_v35 = vadd.f32 %v1275_v27, %v1107_v13  ;;  %v1110_v37 = vadd.f32 %v1094_v40, %v3670_v9  ;;  %v1093_v38 = vmax.f32 %v1071_v41, 0.0  ;;  %v1374_v39 = vadd.f32 %v2513_v46, %v3738_v7 }
 0x1f0   : > { %v1277_v44 = vmax.f32 %v1255_v5, 0.0  ;;  %v1558_v45 = vadd.f32 %v2539_v47, %v3746_v14  ;;  %v1368_v50 = vpop.f32.mrf.mxu0  ;;  %v1552_v55 = vpop.f32.mrf.mxu1 }
 0x1f1   : > { %v3758_v51 = vadd.f32 %v1278_v32, %v1110_v37  ;;  %v1109_v8 = vadd.f32 %v1093_v38, %v3675_v10  ;;  %v1448_v2 = vmax.f32 %v1374_v39, 0.0  ;;  %v1369_v48 = vadd.f32 %v1368_v50, %v3738_v7 }
 0x1f2   : > { %v1632_v11 = vmax.f32 %v1558_v45, 0.0  ;;  %v1553_v49 = vadd.f32 %v1552_v55, %v3746_v14  ;;  %v2516_v6 = vpop.f32.mrf.mxu0  ;;  %v2542_v9 = vpop.f32.mrf.mxu1 }
 0x1f3   : > { %v3763_v52 = vadd.f32 %v1277_v44, %v1109_v8  ;;  %v1464_v63 = vadd.f32 %v1448_v2, %v3680_v29  ;;  %v1447_v53 = vmax.f32 %v1369_v48, 0.0  ;;  %v1384_v12 = vadd.f32 %v2516_v6, %v3738_v7 }
 0x1f4   : > { %v1631_v56 = vmax.f32 %v1553_v49, 0.0  ;;  %v1568_v57 = vadd.f32 %v2542_v9, %v3746_v14  ;;  %v1378_v60 = vpop.f32.mrf.mxu0  ;;  %v1562_v10 = vpop.f32.mrf.mxu1 }
 0x1f5   : > { %v3768_v15 = vadd.f32 %v1632_v11, %v1464_v63   ;;  %v1463_v58 = vadd.f32 %v1447_v53, %v3685_v33  ;;  %v1450_v59 = vmax.f32 %v1384_v12, 0.0  ;;  %v1379_v16 = vadd.f32 %v1378_v60, %v3738_v7 }
 0x1f6   : > { %v1634_v61 = vmax.f32 %v1568_v57, 0.0  ;;  %v1563_v17 = vadd.f32 %v1562_v10, %v3746_v14  ;;  %v2519_v4 = vpop.f32.mrf.mxu0  ;;  %v2545_v29 = vpop.f32.mrf.mxu1 }
 0x1f7   : > { %v3992_v21 = vmov %v3768_v15  ;;  %v3773_v31 = vadd.f32 %v1631_v56, %v1463_v58   ;;  %v1466_v19 = vadd.f32 %v1450_v59, %v3690_v43  ;;  %v1449_v30 = vmax.f32 %v1379_v16, 0.0 }
 0x1f8   : > { %v1394_v23 = vadd.f32 %v2519_v4, %v3738_v7  ;;  %v1633_v18 = vmax.f32 %v1563_v17, 0.0  ;;  %v1578_v15 = vadd.f32 %v2545_v29, %v3746_v14  ;;  %v1388_v24 = vpop.f32.mrf.mxu0  ;;  %v1572_v33 = vpop.f32.mrf.mxu1 }
 0x1f9   : > { %v3778_v13 = vadd.f32 %v1634_v61, %v1466_v19   ;;  %v1465_v36 = vadd.f32 %v1449_v30, %v3695_v54  ;;  %v1389_v1 = vadd.f32 %v1388_v24, %v3738_v7  ;;  %v1573_v41 = vadd.f32 %v1572_v33, %v3746_v14 }
 0x1fa   : > { %v1452_v25 = vmax.f32 %v1394_v23, 0.0  ;;  %v1636_v40 = vmax.f32 %v1578_v15, 0.0  ;;  %v2522_v32 = vpop.f32.mrf.mxu0  ;;  %v2548_v43 = vpop.f32.mrf.mxu1 }
 0x1fb   : > { %v3993_v27 = vmov %v3778_v13  ;;  %v3783_v5 = vadd.f32 %v1633_v18, %v1465_v36   ;;  %v1451_v37 = vmax.f32 %v1389_v1, 0.0  ;;  %v1404_v38 = vadd.f32 %v2522_v32, %v3738_v7 }
 0x1fc   : > { %v1468_v47 = vadd.f32 %v1452_v25, %v3700_v0  ;;  %v1635_v39 = vmax.f32 %v1573_v41, 0.0  ;;  %v1588_v13 = vadd.f32 %v2548_v43, %v3746_v14  ;;  %v1398_v44 = vpop.f32.mrf.mxu0  ;;  %v1582_v54 = vpop.f32.mrf.mxu1 }
 0x1fd   : > { %v3994_v46 = vmov %v3783_v5  ;;  %v1467_v50 = vadd.f32 %v1451_v37, %v3705_v20  ;;  %v1454_v55 = vmax.f32 %v1404_v38, 0.0  ;;  %v1399_v8 = vadd.f32 %v1398_v44, %v3738_v7 }
 0x1fe   : > { %v3788_v11 = vadd.f32 %v1636_v40, %v1468_v47   ;;  %v1638_v2 = vmax.f32 %v1588_v13, 0.0  ;;  %v1583_v48 = vadd.f32 %v1582_v54, %v3746_v14  ;;  %v2525_v49 = vpop.f32.mrf.mxu0  ;;  %v2551_v0 = vpop.f32.mrf.mxu1 }
 0x1ff   : > { %v3793_v12 = vadd.f32 %v1635_v39, %v1467_v50   ;;  %v1470_v6 = vadd.f32 %v1454_v55, %v3710_v28  ;;  %v1453_v9 = vmax.f32 %v1399_v8, 0.0  ;;  %v1414_v53 = vadd.f32 %v2525_v49, %v3738_v7 }
 0x200   : > { %v3995_v45 = vmov %v3788_v11  ;;  %v1637_v56 = vmax.f32 %v1583_v48, 0.0  ;;  %v1598_v11 = vadd.f32 %v2551_v0, %v3746_v14  ;;  %v1408_v57 = vpop.f32.mrf.mxu0  ;;  %v1592_v20 = vpop.f32.mrf.mxu1 }
 0x201   : > { %v3996_v63 = vmov %v3793_v12  ;;  %v3798_v60 = vadd.f32 %v1638_v2, %v1470_v6   ;;  %v1469_v10 = vadd.f32 %v1453_v9, %v3715_v34  ;;  %v1456_v58 = vmax.f32 %v1414_v53, 0.0 }
 0x202   : > { %v1409_v59 = vadd.f32 %v1408_v57, %v3738_v7  ;;  %v1640_v16 = vmax.f32 %v1598_v11, 0.0  ;;  %v1593_v12 = vadd.f32 %v1592_v20, %v3746_v14  ;;  %v2528_v61 = vpop.f32.mrf.mxu0  ;;  %v2554_v28 = vpop.f32.mrf.mxu1 }
 0x203   : > { %v3803_v10 = vadd.f32 %v1637_v56, %v1469_v10   ;;  %v1472_v4 = vadd.f32 %v1456_v58, %v3720_v42  ;;  %v1424_v19 = vadd.f32 %v2528_v61, %v3738_v7  ;;  %v1608_v23 = vadd.f32 %v2554_v28, %v3746_v14 }
 0x204   : > { %v1455_v29 = vmax.f32 %v1409_v59, 0.0  ;;  %v1639_v30 = vmax.f32 %v1593_v12, 0.0  ;;  %v1418_v18 = vpop.f32.mrf.mxu0  ;;  %v1602_v34 = vpop.f32.mrf.mxu1 }
 0x205   : > { %v3997_v17 = vmov %v3803_v10  ;;  %v3808_v15 = vadd.f32 %v1640_v16, %v1472_v4   ;;  %v1458_v36 = vmax.f32 %v1424_v19, 0.0  ;;  %v1419_v25 = vadd.f32 %v1418_v18, %v3738_v7  ;;  %v1663_v18 = vld [vmem:[#allocation2 + $0x30] sm:$0xff] (%p3842_p1) }
 0x206   : > { %v1471_v33 = vadd.f32 %v1455_v29, %v3726_v3  ;;  %v1642_v1 = vmax.f32 %v1608_v23, 0.0  ;;  %v1603_v40 = vadd.f32 %v1602_v34, %v3746_v14  ;;  %v2531_v41 = vpop.f32.mrf.mxu0  ;;  %v2557_v42 = vpop.f32.mrf.mxu1  ;;  %v1776_v23 = vld [vmem:[#allocation8 + $0x60] sm:$0xff] (%p3842_p1)  ;;  %v1775_v34 = vld [vmem:[#allocation8 + $0x58] sm:$0xff] (%p3842_p1) }
 0x207   : > { %v3998_v24 = vmov %v3808_v15  ;;  %v1474_v43 = vadd.f32 %v1458_v36, %v3732_v62  ;;  %v1457_v5 = vmax.f32 %v1419_v25, 0.0  ;;  %v1434_v47 = vadd.f32 %v2531_v41, %v3738_v7  ;;  %v1672_v36 = vld [vmem:[#allocation2 + $0x20] sm:$0xff] (%p3842_p1)  ;;  %v1774_v25 = vld [vmem:[#allocation8 + $0x50] sm:$0xff] (%p3842_p1)  ;;  %v1666_v41 = vld [vmem:[#allocation2 + $0x18] sm:$0xff] (%p3842_p1) }
 0x208   : > { %v3813_v8 = vadd.f32 %v1639_v30, %v1471_v33   ;;  %v1641_v37 = vmax.f32 %v1603_v40, 0.0  ;;  %v1618_v38 = vadd.f32 %v2557_v42, %v3746_v14  ;;  %v1428_v39 = vpop.f32.mrf.mxu0  ;;  %v1612_v3 = vpop.f32.mrf.mxu1  ;;  %v4021_v15 = vmov %v3992_v21  ;;  %v1673_v40 = vld [vmem:[#allocation2 + $0x10] sm:$0xff] (%p3842_p1)  ;;  %v1773_v42 = vld [vmem:[#allocation8 + $0x48] sm:$0xff] (%p3842_p1) }
 0x209   : > { %v3818_v13 = vadd.f32 %v1642_v1, %v1474_v43   ;;  %v1473_v54 = vadd.f32 %v1457_v5, %v3740_v22  ;;  %v1460_v50 = vmax.f32 %v1434_v47, 0.0  ;;  %v1429_v55 = vadd.f32 %v1428_v39, %v3738_v7  ;;  %v1674_v43 = vld [vmem:[#allocation2 + $0x38] sm:$0xff] (%p3842_p1)  ;;  %v1668_v39 = vld [vmem:[#allocation2 + $0x68] sm:$0xff] (%p3842_p1) }
 0x20a   : > { %v3999_v32 = vmov %v3813_v8  ;;  %v1644_v2 = vmax.f32 %v1618_v38, 0.0  ;;  %v1613_v8 = vadd.f32 %v1612_v3, %v3746_v14  ;;  %v2534_v48 = vpop.f32.mrf.mxu0  ;;  %v2560_v62 = vpop.f32.mrf.mxu1  ;;  %v3899_v33 = vadd.f32 (%p3842_p1), %v1663_v18, %v3773_v31  ;;  %v1772_v38 = vld [vmem:[#allocation8 + $0x40] sm:$0xff] (%p3842_p1)  ;;  %v1721_v18 = vld [vmem:[#allocation6 + $0x28] sm:$0xff] (%p3842_p1) }
 0x20b   : > { %v4000_v44 = vmov %v3818_v13  ;;  %v3823_v6 = vadd.f32 %v1641_v37, %v1473_v54   ;;  %v1476_v0 = vadd.f32 %v1460_v50, %v3748_v26  ;;  %v1459_v9 = vmax.f32 %v1429_v55, 0.0  ;;  %v1675_v37 = vld [vmem:[#allocation2 + $0x60] sm:$0xff] (%p3842_p1)  ;;  %v1677_v55 = vld [vmem:[#allocation2 + $0x78] sm:$0xff] (%p3842_p1) }
 0x20c   : > { %v1444_v53 = vadd.f32 %v2534_v48, %v3738_v7  ;;  %v1643_v56 = vmax.f32 %v1613_v8, 0.0  ;;  %v1628_v11 = vadd.f32 %v2560_v62, %v3746_v14  ;;  %v1438_v57 = vpop.f32.mrf.mxu0  ;;  %v1622_v22 = vpop.f32.mrf.mxu1  ;;  %v4011_v5 = vmov %v4000_v44  ;;  %1695 = vst [vmem:[#allocation2 + $0x30] sm:$0xff] (%p3842_p1), %v3899_v33  ;;  %v1678_v48 = vld [vmem:[#allocation2 + $0x28] sm:$0xff] (%p3842_p1)  ;;  %v1770_v62 = vld [vmem:[#allocation8 + $0x30] sm:$0xff] (%p3842_p1) }
 0x20d   : > { %v4001_v49 = vmov %v3823_v6  ;;  %v3828_v3 = vadd.f32 %v1644_v2, %v1476_v0   ;;  %v1475_v10 = vadd.f32 %v1459_v9, %v3753_v35  ;;  %v1439_v59 = vadd.f32 %v1438_v57, %v3738_v7  ;;  %v1779_v35 = vld [vmem:[#allocation8 + $0x78] sm:$0xff] (%p3842_p1)  ;;  %v1667_v5 = vld [vmem:[#allocation2 + $0x50] sm:$0xff] (%p3842_p1)  ;;  %v1717_v57 = vld [vmem:[#allocation6 + $0x8] sm:$0xff] (%p3842_p1) }
 0x20e   : > { %v1462_v58 = vmax.f32 %v1444_v53, 0.0  ;;  %v1623_v16 = vadd.f32 %v1622_v22, %v3746_v14  ;;  %v1646_v6 = vmax.f32 %v1628_v11, 0.0  ;;  %v4013_v7 = vmov %v3998_v24  ;;  %2561 = vmatprep.subr.mxu0 (%p3842_p1), %v1779_v35  ;;  %2617 = vmatprep.subr.mxu1 (%p3842_p1), %v1779_v35  ;;  %v1767_v0 = vld [vmem:[#allocation8 + $0x18] sm:$0xff] (%p3842_p1)  ;;  %v1765_v53 = vld [vmem:[#allocation8 + $0x8] sm:$0xff] (%p3842_p1) }
 0x20f   : > { %v4002_v20 = vmov %v3828_v3  ;;  %v3833_v4 = vadd.f32 %v1643_v56, %v1475_v10   ;;  %v1461_v12 = vmax.f32 %v1439_v59, 0.0  ;;  %v4014_v8 = vmov %v3999_v32  ;;  %2562 = vmatpush3.msra.mxu0 (%p3842_p1), %v1779_v35  ;;  %2633 = vmatpush3.msra.mxu1 (%p3842_p1), %v1779_v35  ;;  %v1671_v7 = vld [vmem:[#allocation2 + $0x40] sm:$0xff] (%p3842_p1)  ;;  %v1725_v22 = vld [vmem:[#allocation6 + $0x48] sm:$0xff] (%p3842_p1) }
 0x210   : > { %v1478_v26 = vadd.f32 %v1462_v58, %v3758_v51  ;;  %v1645_v19 = vmax.f32 %v1623_v16, 0.0  ;;  %v4009_v3 = vmov %v4002_v20  ;;  %v4015_v9 = vmov %v3798_v60  ;;  %v1778_v51 = vld [vmem:[#allocation8 + $0x70] sm:$0xff] (%p3842_p1)  ;;  %v1716_v56 = vld [vmem:[#allocation6] sm:$0xff] (%p3842_p1) }
 0x211   : > { %v4003_v61 = vmov %v3833_v4  ;;  %v1477_v29 = vadd.f32 %v1461_v12, %v3763_v52  ;;  %v4016_v10 = vmov %v3997_v17  ;;  %v4017_v11 = vmov %v3995_v45  ;;  %v1777_v52 = vld [vmem:[#allocation8 + $0x68] sm:$0xff] (%p3842_p1)  ;;  %2563 = vmatprep.subr.mxu0 (%p3842_p1), %v1778_v51  ;;  %2618 = vmatprep.subr.mxu1 (%p3842_p1), %v1778_v51  ;;  %v1676_v3 = vld [vmem:[#allocation2 + $0x70] sm:$0xff] (%p3842_p1) }
 0x212   : > { %v3836_v1 = vadd.f32 %v1646_v6, %v1478_v26   ;;  %v4010_v4 = vmov %v4003_v61  ;;  %v4012_v6 = vmov %v4001_v49  ;;  %v4018_v12 = vmov %v3996_v63  ;;  %84 = sbr.rel (!%p3842_p1) target bundleno = 46 (0x2e), region = 66  ;;  %2564 = vmatpush3.msra.mxu0 (%p3842_p1), %v1778_v51  ;;  %2634 = vmatpush3.msra.mxu1 (%p3842_p1), %v1778_v51  ;;  %v1766_v9 = vld [vmem:[#allocation8 + $0x10] sm:$0xff] (%p3842_p1)  ;;  %v1724_v11 = vld [vmem:[#allocation6 + $0x40] sm:$0xff] (%p3842_p1) }
 0x213   : > { %v3839_v2 = vadd.f32 %v1645_v19, %v1477_v29   ;;  %v4019_v13 = vmov %v3993_v27  ;;  %v4020_v14 = vmov %v3994_v46  ;;  %v4022_v16 = vmov %v3773_v31  ;;  %2565 = vmatprep.subr.mxu0 (%p3842_p1), %v1777_v52  ;;  %2619 = vmatprep.subr.mxu1 (%p3842_p1), %v1777_v52  ;;  %v1665_v31 = vld [vmem:[#allocation2 + $0x58] sm:$0xff] (%p3842_p1)  ;;  %v1718_v10 = vld [vmem:[#allocation6 + $0x10] sm:$0xff] (%p3842_p1)  ;;  %v1720_v19 = vld [vmem:[#allocation6 + $0x20] sm:$0xff] (%p3842_p1) }
 0x214   : > { %v4004_v28 = vmov %v3836_v1  ;;  %2566 = vmatpush3.msra.mxu0 (%p3842_p1), %v1777_v52  ;;  %2635 = vmatpush3.msra.mxu1 (%p3842_p1), %v1777_v52  ;;  %v1664_v14 = vld [vmem:[#allocation2] sm:$0xff] (%p3842_p1)  ;;  %v3902_v4 = vadd.f32 (%p3842_p1), %v1671_v7, %v3999_v32  ;;  %v3921_v32 = vadd.f32 (%p3842_p1), %v1666_v41, %v3993_v27  ;;  %v3928_v47 = vadd.f32 (%p3842_p1), %v1667_v5, %v3996_v63  ;;  %v1669_v13 = vld [vmem:[#allocation2 + $0x8] sm:$0xff] (%p3842_p1)  ;;  %v1726_v58 = vld [vmem:[#allocation6 + $0x50] sm:$0xff] (%p3842_p1) }
 0x215   : > { %v4005_v30 = vmov %v3839_v2  ;;  %v4007_v1 = vmov %v4004_v28  ;;  %2567 = vmatprep.subr.mxu0 (%p3842_p1), %v1776_v23  ;;  %2620 = vmatprep.subr.mxu1 (%p3842_p1), %v1776_v23  ;;  %v3905_v15 = vadd.f32 (%p3842_p1), %v1664_v14, %v3992_v21  ;;  %v3914_v21 = vadd.f32 (%p3842_p1), %v1665_v31, %v3994_v46  ;;  %v1727_v29 = vld [vmem:[#allocation6 + $0x58] sm:$0xff] (%p3842_p1)  ;;  %v1730_v7 = vld [vmem:[#allocation6 + $0x70] sm:$0xff] (%p3842_p1) }
 0x216   : > { %v4008_v2 = vmov %v4005_v30  ;;  %2568 = vmatpush3.msra.mxu0 (%p3842_p1), %v1776_v23  ;;  %2636 = vmatpush3.msra.mxu1 (%p3842_p1), %v1776_v23  ;;  %v3909_v1 = vadd.f32 (%p3842_p1), %v1672_v36, %v3998_v24  ;;  %1703 = vst [vmem:[#allocation2 + $0x40] sm:$0xff] (%p3842_p1), %v3902_v4  ;;  %v3918_v24 = vadd.f32 (%p3842_p1), %v1673_v40, %v4001_v49  ;;  %1698 = vst [vmem:[#allocation2 + $0x18] sm:$0xff] (%p3842_p1), %v3921_v32  ;;  %v1768_v49 = vld [vmem:[#allocation8 + $0x20] sm:$0xff] (%p3842_p1) }
 0x217   :  { %2569 = vmatprep.subr.mxu0 %v1775_v34  ;;  %2621 = vmatprep.subr.mxu1 %v1775_v34  ;;  %1696 = vst [vmem:[#allocation2] sm:$0xff] %v3905_v15  ;;  %1697 = vst [vmem:[#allocation2 + $0x58] sm:$0xff] %v3914_v21  ;;  %v3925_v46 = vadd.f32 %v1674_v43, %v4000_v44  ;;  %v3933_v27 = vadd.f32 %v1675_v37, %v4003_v61  ;;  %v1771_v44 = vld [vmem:[#allocation8 + $0x38] sm:$0xff]  ;;  %v1670_v2 = vld [vmem:[#allocation2 + $0x48] sm:$0xff] }
 0x218   :  { %2570 = vmatpush3.msra.mxu0 %v1775_v34  ;;  %2637 = vmatpush3.msra.mxu1 %v1775_v34  ;;  %1704 = vst [vmem:[#allocation2 + $0x20] sm:$0xff] %v3909_v1  ;;  %1705 = vst [vmem:[#allocation2 + $0x10] sm:$0xff] %v3918_v24  ;;  %v3938_v63 = vadd.f32 %v1668_v39, %v3995_v45  ;;  %v3942_v54 = vadd.f32 %v1676_v3, %v4002_v20  ;;  %v1764_v20 = vld [vmem:[#allocation8] sm:$0xff]  ;;  %v1729_v34 = vld [vmem:[#allocation6 + $0x68] sm:$0xff] }
 0x219   :  { %2571 = vmatprep.subr.mxu0 %v1774_v25  ;;  %2622 = vmatprep.subr.mxu1 %v1774_v25  ;;  %1706 = vst [vmem:[#allocation2 + $0x38] sm:$0xff] %v3925_v46  ;;  %1699 = vst [vmem:[#allocation2 + $0x50] sm:$0xff] %v3928_v47  ;;  %v3945_v50 = vadd.f32 %v1669_v13, %v3997_v17  ;;  %v3949_v45 = vadd.f32 %v1677_v55, %v4005_v30  ;;  %v1728_v30 = vld [vmem:[#allocation6 + $0x60] sm:$0xff] }
 0x21a   :  { %2572 = vmatpush3.msra.mxu0 %v1774_v25  ;;  %2638 = vmatpush3.msra.mxu1 %v1774_v25  ;;  %1707 = vst [vmem:[#allocation2 + $0x60] sm:$0xff] %v3933_v27  ;;  %1700 = vst [vmem:[#allocation2 + $0x68] sm:$0xff] %v3938_v63  ;;  %v3952_v8 = vadd.f32 %v1670_v2, %v3798_v60  ;;  %v3957_v17 = vadd.f32 %v1678_v48, %v4004_v28  ;;  %v1769_v60 = vld [vmem:[#allocation8 + $0x28] sm:$0xff]  ;;  %v1719_v28 = vld [vmem:[#allocation6 + $0x18] sm:$0xff] }
 0x21b   :  { %2573 = vmatprep.subr.mxu0 %v1773_v42  ;;  %2623 = vmatprep.subr.mxu1 %v1773_v42  ;;  %1708 = vst [vmem:[#allocation2 + $0x70] sm:$0xff] %v3942_v54  ;;  %1701 = vst [vmem:[#allocation2 + $0x8] sm:$0xff] %v3945_v50  ;;  %v1748_v59 = vadd.f32 %v1716_v56, %v3899_v33  ;;  %v1756_v16 = vadd.f32 %v1724_v11, %v3902_v4  ;;  %v1722_v33 = vld [vmem:[#allocation6 + $0x30] sm:$0xff]  ;;  %v1723_v25 = vld [vmem:[#allocation6 + $0x38] sm:$0xff] }
 0x21c   :  { %2574 = vmatpush3.msra.mxu0 %v1773_v42  ;;  %2639 = vmatpush3.msra.mxu1 %v1773_v42  ;;  %1709 = vst [vmem:[#allocation2 + $0x78] sm:$0xff] %v3949_v45  ;;  %1702 = vst [vmem:[#allocation2 + $0x48] sm:$0xff] %v3952_v8  ;;  %v1749_v61 = vadd.f32 %v1717_v57, %v3905_v15  ;;  %v1757_v26 = vadd.f32 %v1725_v22, %v3909_v1  ;;  %v1731_v1 = vld [vmem:[#allocation6 + $0x78] sm:$0xff] }
 0x21d   :  { %2575 = vmatprep.subr.mxu0 %v1772_v38  ;;  %2624 = vmatprep.subr.mxu1 %v1772_v38  ;;  %1710 = vst [vmem:[#allocation2 + $0x28] sm:$0xff] %v3957_v17  ;;  %v1750_v6 = vadd.f32 %v1718_v10, %v3914_v21  ;;  %v1758_v12 = vadd.f32 %v1726_v58, %v3918_v24  ;;  %v2184_v21 = vld [vmem:[%s3990_s3] ss:$0 sm:$0xff]  ;;  %s3023_s3 = smov [#allocation9]  }
 0x21e   :  { %2576 = vmatpush3.msra.mxu0 %v1772_v38  ;;  %2640 = vmatpush3.msra.mxu1 %v1772_v38  ;;  %v1751_v35 = vadd.f32 %v1719_v28, %v3921_v32  ;;  %v1759_v51 = vadd.f32 %v1727_v29, %v3925_v46  ;;  %v1752_v52 = vadd.f32 %v1720_v19, %v3928_v47  ;;  %s1969_s10 = sshll.u32 %s3023_s3, 4  ;;  %s1970_s10 = int_to_ptr.vmem [resolvable:$true] %s1969_s10 }
 0x21f   :  { %2577 = vmatprep.subr.mxu0 %v1771_v44  ;;  %2625 = vmatprep.subr.mxu1 %v1771_v44  ;;  %v1760_v23 = vadd.f32 %v1728_v30, %v3933_v27  ;;  %v1753_v14 = vadd.f32 %v1721_v18, %v3938_v63  ;;  %v1761_v4 = vadd.f32 %v1729_v34, %v3942_v54  ;;  %s2854_s11 = scalar_lea.vmem %s1970_s10, 2048  ;;  %p2859_p3 = scmp.lt.s32.totalorder %s1970_s10, %s1970_s10 }
 0x220   :  { %2578 = vmatpush3.msra.mxu0 %v1771_v44  ;;  %2641 = vmatpush3.msra.mxu1 %v1771_v44  ;;  %v1754_v15 = vadd.f32 %v1722_v33, %v3945_v50  ;;  %v1762_v36 = vadd.f32 %v1730_v7, %v3949_v45  ;;  %v1755_v31 = vadd.f32 %v1723_v25, %v3952_v8  ;;  %p2855_p2 = scmp.ne.s32.totalorder %s1970_s10, %s2854_s11  ;;  %p2860_p4 = scmp.lt.s32.totalorder %s2854_s11, %s2854_s11 }
 0x221   :  { %2579 = vmatprep.subr.mxu0 %v1770_v62  ;;  %2626 = vmatprep.subr.mxu1 %v1770_v62  ;;  %v1763_v40 = vadd.f32 %v1731_v1, %v3957_v17 }
 0x222   :  { %2580 = vmatpush3.msra.mxu0 %v1770_v62  ;;  %2642 = vmatpush3.msra.mxu1 %v1770_v62  ;;  %p2861_p5 = por %p2860_p4, %p2859_p3 }
 0x223   :  { %2581 = vmatprep.subr.mxu0 %v1769_v60  ;;  %2627 = vmatprep.subr.mxu1 %v1769_v60 }
 0x224   :  { %2582 = vmatpush3.msra.mxu0 %v1769_v60  ;;  %2643 = vmatpush3.msra.mxu1 %v1769_v60  ;;  %p2862_p6 = pnand %p2861_p5, %p2855_p2 }
 0x225   :  { %2583 = vmatprep.subr.mxu0 %v1768_v49  ;;  %2628 = vmatprep.subr.mxu1 %v1768_v49 }
 0x226   :  { %2584 = vmatpush3.msra.mxu0 %v1768_v49  ;;  %2644 = vmatpush3.msra.mxu1 %v1768_v49 }
 0x227   :  { %2585 = vmatprep.subr.mxu0 %v1767_v0  ;;  %2629 = vmatprep.subr.mxu1 %v1767_v0 }
 0x228   :  { %2586 = vmatpush3.msra.mxu0 %v1767_v0  ;;  %2645 = vmatpush3.msra.mxu1 %v1767_v0 }
 0x229   :  { %2587 = vmatprep.subr.mxu0 %v1766_v9  ;;  %2630 = vmatprep.subr.mxu1 %v1766_v9 }
 0x22a   :  { %2588 = vmatpush3.msra.mxu0 %v1766_v9  ;;  %2646 = vmatpush3.msra.mxu1 %v1766_v9 }
 0x22b   :  { %2589 = vmatprep.subr.mxu0 %v1765_v53  ;;  %2631 = vmatprep.subr.mxu1 %v1765_v53 }
 0x22c   :  { %2590 = vmatpush3.msra.mxu0 %v1765_v53  ;;  %2647 = vmatpush3.msra.mxu1 %v1765_v53 }
 0x22d   :  { %2591 = vmatprep.subr.mxu0 %v1764_v20  ;;  %2632 = vmatprep.subr.mxu1 %v1764_v20 }
 0x22e   :  { %2592 = vmatpush3.msra.mxu0 %v1764_v20  ;;  %2648 = vmatpush3.msra.mxu1 %v1764_v20 }
 0x22f   :  { %2593 = vmatprep.mubr.f32.mxu0 %v1748_v59  ;;  %2605 = vmatprep.mubr.f32.mxu1 %v1756_v16 }
 0x230   :  { %2594 = vmatmul.mubr.f32.vlgmr.msra.gmra.mxu0 %v1749_v61  ;;  %2606 = vmatmul.mubr.f32.vlgmr.msra.gmra.mxu1 %v1757_v26 }
 0x231   :  { %2596 = vmatprep.mubr.f32.mxu0 %v1750_v6  ;;  %2608 = vmatprep.mubr.f32.mxu1 %v1758_v12 }
 0x234   :  { %2597 = vmatmul.mubr.f32.gmra.mxu0 %v1751_v35  ;;  %2609 = vmatmul.mubr.f32.gmra.mxu1 %v1759_v51 }
 0x235   :  { %2599 = vmatprep.mubr.f32.mxu0 %v1752_v52  ;;  %2611 = vmatprep.mubr.f32.mxu1 %v1760_v23 }
 0x238   :  { %2600 = vmatmul.mubr.f32.gmra.mxu0 %v1753_v14  ;;  %2612 = vmatmul.mubr.f32.gmra.mxu1 %v1761_v4 }
 0x239   :  { %2602 = vmatprep.mubr.f32.mxu0 %v1754_v15  ;;  %2614 = vmatprep.mubr.f32.mxu1 %v1762_v36 }
 0x23c   :  { %2603 = vmatmul.mubr.f32.gmra.mxu0 %v1755_v31  ;;  %2615 = vmatmul.mubr.f32.gmra.mxu1 %v1763_v40 }
 0x2f0   :  { %v2595_v41 = vpop.f32.mrf.mxu0  ;;  %v2607_v42 = vpop.f32.mrf.mxu1 }
 0x2f1   :  { %v1859_v24 = vadd.f32 %v2595_v41, %v2184_v21  ;;  %v1899_v32 = vadd.f32 %v2607_v42, %v2184_v21 }
 0x2f2   :  { %v1853_v43 = vpop.f32.mrf.mxu0  ;;  %v1893_v5 = vpop.f32.mrf.mxu1 }
 0x2f3   :  { %v1933_v46 = vmax.f32 %v1859_v24, 0.0  ;;  %v1941_v47 = vmax.f32 %v1899_v32, 0.0  ;;  %v1854_v37 = vadd.f32 %v2184_v21, %v1853_v43  ;;  %v1894_v38 = vadd.f32 %v2184_v21, %v1893_v5 }
 0x2f4   :  { %v2598_v27 = vpop.f32.mrf.mxu0  ;;  %v2610_v39 = vpop.f32.mrf.mxu1 }
 0x2f5   :  { %1949 = vst [vmem:[#allocation9 + $0x8] sm:$0xff] %v1933_v46  ;;  %1957 = vst [vmem:[#allocation9 + $0x48] sm:$0xff] %v1941_v47  ;;  %v1932_v3 = vmax.f32 %v1854_v37, 0.0  ;;  %v1940_v63 = vmax.f32 %v1894_v38, 0.0  ;;  %v1869_v13 = vadd.f32 %v2598_v27, %v2184_v21  ;;  %v1909_v44 = vadd.f32 %v2610_v39, %v2184_v21 }
 0x2f6   :  { %v1863_v54 = vpop.f32.mrf.mxu0  ;;  %v1903_v50 = vpop.f32.mrf.mxu1 }
 0x2f7   :  { %1948 = vst [vmem:[#allocation9] sm:$0xff] %v1932_v3  ;;  %1956 = vst [vmem:[#allocation9 + $0x40] sm:$0xff] %v1940_v63  ;;  %v1935_v55 = vmax.f32 %v1869_v13, 0.0  ;;  %v1943_v2 = vmax.f32 %v1909_v44, 0.0  ;;  %v1864_v45 = vadd.f32 %v2184_v21, %v1863_v54  ;;  %v1904_v8 = vadd.f32 %v2184_v21, %v1903_v50 }
 0x2f8   :  { %v2601_v48 = vpop.f32.mrf.mxu0  ;;  %v2613_v62 = vpop.f32.mrf.mxu1 }
 0x2f9   :  { %1951 = vst [vmem:[#allocation9 + $0x18] sm:$0xff] %v1935_v55  ;;  %1959 = vst [vmem:[#allocation9 + $0x58] sm:$0xff] %v1943_v2  ;;  %v1934_v17 = vmax.f32 %v1864_v45, 0.0  ;;  %v1942_v60 = vmax.f32 %v1904_v8, 0.0  ;;  %v1879_v49 = vadd.f32 %v2601_v48, %v2184_v21  ;;  %v1919_v0 = vadd.f32 %v2613_v62, %v2184_v21 }
 0x2fa   :  { %v1873_v9 = vpop.f32.mrf.mxu0  ;;  %v1913_v53 = vpop.f32.mrf.mxu1 }
 0x2fb   :  { %1950 = vst [vmem:[#allocation9 + $0x10] sm:$0xff] %v1934_v17  ;;  %1958 = vst [vmem:[#allocation9 + $0x50] sm:$0xff] %v1942_v60  ;;  %v1937_v56 = vmax.f32 %v1879_v49, 0.0  ;;  %v1945_v11 = vmax.f32 %v1919_v0, 0.0  ;;  %v1874_v57 = vadd.f32 %v2184_v21, %v1873_v9  ;;  %v1914_v22 = vadd.f32 %v2184_v21, %v1913_v53 }
 0x2fc   :  { %v2604_v20 = vpop.f32.mrf.mxu0  ;;  %v2616_v10 = vpop.f32.mrf.mxu1 }
 0x2fd   :  { %1953 = vst [vmem:[#allocation9 + $0x28] sm:$0xff] %v1937_v56  ;;  %1961 = vst [vmem:[#allocation9 + $0x68] sm:$0xff] %v1945_v11  ;;  %v1936_v58 = vmax.f32 %v1874_v57, 0.0  ;;  %v1944_v59 = vmax.f32 %v1914_v22, 0.0  ;;  %v1889_v16 = vadd.f32 %v2604_v20, %v2184_v21  ;;  %v1929_v61 = vadd.f32 %v2616_v10, %v2184_v21 }
 0x2fe   :  { %v1883_v26 = vpop.f32.mrf.mxu0  ;;  %v1923_v6 = vpop.f32.mrf.mxu1 }
 0x2ff   :  { %1952 = vst [vmem:[#allocation9 + $0x20] sm:$0xff] %v1936_v58  ;;  %1960 = vst [vmem:[#allocation9 + $0x60] sm:$0xff] %v1944_v59  ;;  %v1939_v12 = vmax.f32 %v1889_v16, 0.0  ;;  %v1947_v28 = vmax.f32 %v1929_v61, 0.0  ;;  %v1884_v29 = vadd.f32 %v2184_v21, %v1883_v26  ;;  %v1924_v19 = vadd.f32 %v2184_v21, %v1923_v6 }
 0x301   :  { %1955 = vst [vmem:[#allocation9 + $0x38] sm:$0xff] %v1939_v12  ;;  %1963 = vst [vmem:[#allocation9 + $0x78] sm:$0xff] %v1947_v28  ;;  %v1938_v30 = vmax.f32 %v1884_v29, 0.0  ;;  %v1946_v35 = vmax.f32 %v1924_v19, 0.0 }
 0x303   :  { %1954 = vst [vmem:[#allocation9 + $0x30] sm:$0xff] %v1938_v30  ;;  %1962 = vst [vmem:[#allocation9 + $0x70] sm:$0xff] %v1946_v35 }
 0x304   :  { %2865 = shalt.err (!%p2862_p6)
}
 0x305   :  { %1975 = dma.vmem_to_hbm [thread:$0]  %s1970_s10, 2048, %s3991_s4, [#allocation5], %s3018_s20, %s3018_s20, %s3019_s21  }
 0x306   :  { %2946 = dma.done.wait [#allocation5], 2048  }
 0x307   :  { %2947 = vsyncadd [#allocation5], 4294965248 }
 0x308   :  { %1979 = vsyncpa [#allocation4], 1 }
 0x309   :  { %1980 = vsyncpa [#allocation7], 1 }
 0x30a   :  { %1981 = vsyncpa [#allocation5], 1 }

</bundles_post_ra>
